<compile_context>
chip_gen: v6e
topology: v6e:2x2x1
jax: 0.10.0
libtpu: 0.0.40
codegen_flags: <defaults>
</compile_context>

<pallas_src>
import functools
import math

import jax
import jax.numpy as jnp
from jax.experimental import pallas as pl
from jax.experimental.pallas import tpu as pltpu

_VMEM_LIMIT = 32 * 1024 * 1024  # safe on v5e/v6e/v7x


def _pick_block(dim, target, align):
    """Largest block <= target that divides dim and is a multiple of align;
    falls back to the full dim (block == full array dim is always legal)."""
    if dim <= target:
        return dim
    t = (target // align) * align
    while t >= align:
        if dim % t == 0:
            return t
        t -= align
    return dim


# ---------------------------------------------------------------------------
# Tiled linear kernel:  out = x @ w_t + b   (w_t already transposed: (Din, Dout))
# ---------------------------------------------------------------------------
def _linear_kernel(x_ref, w_ref, b_ref, o_ref, acc_ref):
    k = pl.program_id(2)

    @pl.when(k == 0)
    def _():
        acc_ref[...] = jnp.zeros_like(acc_ref)

    acc_ref[...] += jnp.dot(x_ref[...], w_ref[...],
                            preferred_element_type=jnp.float32)

    @pl.when(k == pl.num_programs(2) - 1)
    def _():
        o_ref[...] = (acc_ref[...] + b_ref[...]).astype(o_ref.dtype)


def linear(x, w_t, b, *, tm_target=256, tn_target=256, tk_target=512):
    """x: (M, Din); w_t: (Din, Dout) pre-transposed; b: (Dout,)."""
    M, Din = x.shape
    Dout = w_t.shape[1]
    tm = _pick_block(M, tm_target, 8)
    tn = _pick_block(Dout, tn_target, 128)
    tk = _pick_block(Din, tk_target, 128)
    grid = (M // tm, Dout // tn, Din // tk)
    return pl.pallas_call(
        _linear_kernel,
        grid=grid,
        out_shape=jax.ShapeDtypeStruct((M, Dout), x.dtype),
        in_specs=[
            pl.BlockSpec((tm, tk), lambda i, j, k: (i, k)),
            pl.BlockSpec((tk, tn), lambda i, j, k: (k, j)),
            pl.BlockSpec((1, tn), lambda i, j, k: (0, j)),
        ],
        out_specs=pl.BlockSpec((tm, tn), lambda i, j, k: (i, j)),
        scratch_shapes=[pltpu.VMEM((tm, tn), jnp.float32)],
        compiler_params=pltpu.CompilerParams(
            dimension_semantics=("parallel", "parallel", "arbitrary"),
            vmem_limit_bytes=_VMEM_LIMIT),
    )(x, w_t, b.reshape(1, Dout))


# ---------------------------------------------------------------------------
# Fused q/k/v projection: x tile is read once, three matmuls per grid step.
# ---------------------------------------------------------------------------
def _qkv_linear_kernel(x_ref, wq_ref, wk_ref, wv_ref, bq_ref, bk_ref, bv_ref,
                       q_ref, k_ref, v_ref, qacc, kacc, vacc):
    kk = pl.program_id(2)

    @pl.when(kk == 0)
    def _():
        qacc[...] = jnp.zeros_like(qacc)
        kacc[...] = jnp.zeros_like(kacc)
        vacc[...] = jnp.zeros_like(vacc)

    x = x_ref[...]
    qacc[...] += jnp.dot(x, wq_ref[...], preferred_element_type=jnp.float32)
    kacc[...] += jnp.dot(x, wk_ref[...], preferred_element_type=jnp.float32)
    vacc[...] += jnp.dot(x, wv_ref[...], preferred_element_type=jnp.float32)

    @pl.when(kk == pl.num_programs(2) - 1)
    def _():
        q_ref[...] = (qacc[...] + bq_ref[...]).astype(q_ref.dtype)
        k_ref[...] = (kacc[...] + bk_ref[...]).astype(k_ref.dtype)
        v_ref[...] = (vacc[...] + bv_ref[...]).astype(v_ref.dtype)


def qkv_linear(x, wq_t, wk_t, wv_t, bq, bk, bv,
               *, tm_target=256, tn_target=256, tk_target=512):
    """Fused self-attention projection.  x: (M, E); w*_t: (E, E); b*: (E,)."""
    M, Din = x.shape
    E = wq_t.shape[1]
    tm = _pick_block(M, tm_target, 8)
    tn = _pick_block(E, tn_target, 128)
    tk = _pick_block(Din, tk_target, 128)
    grid = (M // tm, E // tn, Din // tk)
    x_spec = pl.BlockSpec((tm, tk), lambda i, j, k: (i, k))
    w_spec = pl.BlockSpec((tk, tn), lambda i, j, k: (k, j))
    b_spec = pl.BlockSpec((1, tn), lambda i, j, k: (0, j))
    o_spec = pl.BlockSpec((tm, tn), lambda i, j, k: (i, j))
    o_sds = jax.ShapeDtypeStruct((M, E), x.dtype)
    return pl.pallas_call(
        _qkv_linear_kernel,
        grid=grid,
        out_shape=(o_sds, o_sds, o_sds),
        in_specs=[x_spec, w_spec, w_spec, w_spec, b_spec, b_spec, b_spec],
        out_specs=(o_spec, o_spec, o_spec),
        scratch_shapes=[pltpu.VMEM((tm, tn), jnp.float32),
                        pltpu.VMEM((tm, tn), jnp.float32),
                        pltpu.VMEM((tm, tn), jnp.float32)],
        compiler_params=pltpu.CompilerParams(
            dimension_semantics=("parallel", "parallel", "arbitrary"),
            vmem_limit_bytes=_VMEM_LIMIT),
    )(x, wq_t, wk_t, wv_t, bq.reshape(1, E), bk.reshape(1, E), bv.reshape(1, E))


# ---------------------------------------------------------------------------
# Attention core: per grid step = (one batch element, one q tile, ALL heads).
# Emits the attention output (lane-dense E last dim) and, optionally, the
# head-averaged attention weights (B, T, S) directly.
# ---------------------------------------------------------------------------
def _attn_kernel(q_ref, k_ref, v_ref, *out_refs,
                 num_heads, head_dim, need_weights):
    # q_ref: (tq, 1, 1, E); k_ref/v_ref: (S, 1, 1, E)
    o_ref = out_refs[0]                                   # (tq, 1, 1, E)
    w_ref = out_refs[1] if need_weights else None         # (1, tq, S)
    tq = q_ref.shape[0]
    S = k_ref.shape[0]
    if need_weights:
        w_acc = jnp.zeros((tq, S), jnp.float32)
    for h in range(num_heads):
        lo = h * head_dim
        hi = lo + head_dim
        qh = q_ref[:, 0, 0, lo:hi]        # (tq, D) -- q already pre-scaled
        kh = k_ref[:, 0, 0, lo:hi]        # (S, D)
        vh = v_ref[:, 0, 0, lo:hi]        # (S, D)
        # scores = qh @ kh^T: contract last dims directly (no explicit transpose)
        s = jax.lax.dot_general(qh, kh, (((1,), (1,)), ((), ())),
                                preferred_element_type=jnp.float32)   # (tq, S)
        m = jnp.max(s, axis=-1, keepdims=True)
        e = jnp.exp(s - m)
        p = e * pl.reciprocal(jnp.sum(e, axis=-1, keepdims=True), approx=True)
        if need_weights:
            w_acc = w_acc + p
        oh = jnp.dot(p.astype(vh.dtype), vh,
                     preferred_element_type=jnp.float32)              # (tq, D)
        o_ref[:, 0, 0, lo:hi] = oh.astype(o_ref.dtype)
    if need_weights:
        w_ref[0] = (w_acc * (1.0 / num_heads)).astype(w_ref.dtype)


def attention_core(q, k, v, *, num_heads, need_weights=True, tq_target=256):
    """q: (T, B, 1, E); k, v: (S, B, 1, E) -> ((T, B, 1, E), (B, T, S)|None)."""
    # TODO(synk): for very long sequences, tile S with a flash-style online
    # softmax (the (tq, S) score block scales quadratically otherwise).
    T, B, _, E = q.shape
    S = k.shape[0]
    D = E // num_heads
    tq = _pick_block(T, tq_target, 8)
    grid = (B, T // tq)
    kernel = functools.partial(_attn_kernel, num_heads=num_heads, head_dim=D,
                               need_weights=need_weights)
    out_shape = [jax.ShapeDtypeStruct((T, B, 1, E), q.dtype)]
    out_specs = [pl.BlockSpec((tq, 1, 1, E), lambda b, t: (t, b, 0, 0))]
    if need_weights:
        out_shape.append(jax.ShapeDtypeStruct((B, T, S), jnp.float32))
        out_specs.append(pl.BlockSpec((1, tq, S), lambda b, t: (b, t, 0)))
    outs = pl.pallas_call(
        kernel,
        grid=grid,
        out_shape=tuple(out_shape),
        in_specs=[
            pl.BlockSpec((tq, 1, 1, E), lambda b, t: (t, b, 0, 0)),
            pl.BlockSpec((S, 1, 1, E), lambda b, t: (0, b, 0, 0)),
            pl.BlockSpec((S, 1, 1, E), lambda b, t: (0, b, 0, 0)),
        ],
        out_specs=tuple(out_specs),
        compiler_params=pltpu.CompilerParams(
            dimension_semantics=("parallel", "parallel"),
            vmem_limit_bytes=_VMEM_LIMIT),
    )(q, k, v)
    if need_weights:
        attn4, attn_w = outs
    else:
        attn4 = outs[0] if isinstance(outs, (tuple, list)) else outs
        attn_w = None
    return attn4, attn_w


# ---------------------------------------------------------------------------
# Full forward (semantics of MultiheadAttention.forward, standard path,
# need_weights=True / need_head_weights=False, dropout=0, no masks).
# ---------------------------------------------------------------------------
def multihead_attention_forward(query, key, value, params, num_heads,
                                need_weights=True, self_attention=None):
    # TODO(synk): incremental_state / key_padding_mask / attn_mask / bias_kv /
    # add_zero_attn / dropout paths are not implemented (eval-mode unmasked path).
    T, B, E = query.shape
    H = num_heads
    if self_attention is None:
        self_attention = (key is query) and (value is query)

    if self_attention:
        S = T
        q2d, k2d, v2d = qkv_linear(
            query.reshape(T * B, E),
            params["q_wt"], params["k_wt"], params["v_wt"],
            params["q_b"], params["k_b"], params["v_b"])
    else:
        # TODO(synk): fuse the k/v projections when key is value (enc-dec attn).
        S = key.shape[0]
        q2d = linear(query.reshape(T * B, E), params["q_wt"], params["q_b"])
        k2d = linear(key.reshape(S * B, E), params["k_wt"], params["k_b"])
        v2d = linear(value.reshape(S * B, E), params["v_wt"], params["v_b"])

    # Free reshapes only (no XLA transposes); heads live as lane slices of E.
    q = q2d.reshape(T, B, 1, E)
    k = k2d.reshape(S, B, 1, E)
    v = v2d.reshape(S, B, 1, E)

    attn4, attn_weights = attention_core(q, k, v, num_heads=H,
                                         need_weights=need_weights)

    out = linear(attn4.reshape(T * B, E), params["out_wt"], params["out_b"])
    return out.reshape(T, B, E), attn_weights


# ---------------------------------------------------------------------------
# Deterministic parameter init (matches reset_parameters) + one-time prep.
# ---------------------------------------------------------------------------
def xavier_uniform(key, out_dim, in_dim, gain=1.0):
    bound = gain * math.sqrt(6.0 / (in_dim + out_dim))
    return jax.random.uniform(key, (out_dim, in_dim), jnp.float32,
                              minval=-bound, maxval=bound)


def init_params(key, embed_dim):
    ks = jax.random.split(key, 7)
    g = 1.0 / math.sqrt(2.0)          # qkv_same_dim -> gain = 1/sqrt(2)
    bb = 1.0 / math.sqrt(embed_dim)   # nn.Linear default bias bound
    return {
        "k_w": xavier_uniform(ks[0], embed_dim, embed_dim, g),
        "v_w": xavier_uniform(ks[1], embed_dim, embed_dim, g),
        "q_w": xavier_uniform(ks[2], embed_dim, embed_dim, g),
        "out_w": xavier_uniform(ks[3], embed_dim, embed_dim, 1.0),
        "k_b": jax.random.uniform(ks[4], (embed_dim,), jnp.float32, -bb, bb),
        "v_b": jax.random.uniform(ks[5], (embed_dim,), jnp.float32, -bb, bb),
        "q_b": jax.random.uniform(ks[6], (embed_dim,), jnp.float32, -bb, bb),
        "out_b": jnp.zeros((embed_dim,), jnp.float32),  # constant_(0.0)
    }


def prepare_params(raw, num_heads):
    """One-time prep: pre-transpose weights to (Din, Dout) and fold the
    head_dim**-0.5 scaling into the q projection."""
    E = raw["q_w"].shape[0]
    scaling = (E // num_heads) ** (-0.5)
    return {
        "q_wt": (raw["q_w"] * scaling).T, "q_b": raw["q_b"] * scaling,
        "k_wt": raw["k_w"].T, "k_b": raw["k_b"],
        "v_wt": raw["v_w"].T, "v_b": raw["v_b"],
        "out_wt": raw["out_w"].T, "out_b": raw["out_b"],
    }


if __name__ == "__main__":
    T, B, E, H = 8, 2, 32, 4
    key = jax.random.PRNGKey(0)
    kp, kq = jax.random.split(key)
    params = prepare_params(init_params(kp, E), H)
    query = jax.random.normal(kq, (T, B, E), jnp.float32)

    fwd = jax.jit(multihead_attention_forward,
                  static_argnames=("num_heads", "need_weights", "self_attention"))
    out, attn_w = fwd(query, query, query, params, num_heads=H,
                      self_attention=True)
    jax.block_until_ready(out)
    jax.block_until_ready(attn_w)
    assert out.shape == (T, B, E)
    assert attn_w.shape == (B, T, T)
    assert bool(jnp.all(jnp.isfinite(out)))
    # softmax rows (head-averaged) should sum to ~1
    assert bool(jnp.allclose(attn_w.sum(-1), 1.0, atol=5e-2))
    print("KERNEL_OK")
</pallas_src>

<mosaic_0001>
module attributes {stable_mosaic.version = 11 : i64} {
  func.func @_linear_kernel(%arg0: i32, %arg1: i32, %arg2: i32, %arg3: memref<16x32xf32, #tpu.memory_space<vmem>>, %arg4: memref<32x32xf32, #tpu.memory_space<vmem>>, %arg5: memref<1x32xf32, #tpu.memory_space<vmem>>, %arg6: memref<16x32xf32, #tpu.memory_space<vmem>>, %arg7: memref<16x32xf32, #tpu.memory_space<vmem>>) attributes {dimension_semantics = [#tpu.dimension_semantics<parallel>, #tpu.dimension_semantics<parallel>, #tpu.dimension_semantics<arbitrary>], iteration_bounds = array<i64: 1, 1, 1>, scalar_prefetch = 0 : i64, scratch_operands = 1 : i64, tpu.core_type = #tpu.core_type<tc>, window_params = [{transform_indices = @transform_0, window_bounds = array<i64: 16, 32>}, {transform_indices = @transform_1, window_bounds = array<i64: 32, 32>}, {transform_indices = @transform_2, window_bounds = array<i64: 1, 32>}, {transform_indices = @transform_3, window_bounds = array<i64: 16, 32>}]} {
    %c0_i32 = arith.constant 0 : i32
    %0 = arith.cmpi eq, %arg2, %c0_i32 : i32
    %1 = arith.extui %0 : i1 to i32
    %c0_i32_0 = arith.constant 0 : i32
    %2 = arith.cmpi ne, %1, %c0_i32_0 : i32
    scf.if %2 {
      %cst_10 = arith.constant 0.000000e+00 : f32
      %12 = vector.broadcast %cst_10 : f32 to vector<16x32xf32>
      %c0_11 = arith.constant 0 : index
      %c0_12 = arith.constant 0 : index
      %13 = vector.load %arg7[%c0_11, %c0_12] : memref<16x32xf32, #tpu.memory_space<vmem>>, vector<16x32xf32>
      tpu.vector_store %arg7[%c0_11, %c0_12], %12 {strides = array<i32>} : memref<16x32xf32, #tpu.memory_space<vmem>>, vector<16x32xf32>,
    } else {
    }
    %c0 = arith.constant 0 : index
    %c0_1 = arith.constant 0 : index
    %3 = vector.load %arg7[%c0, %c0_1] : memref<16x32xf32, #tpu.memory_space<vmem>>, vector<16x32xf32>
    %c0_2 = arith.constant 0 : index
    %c0_3 = arith.constant 0 : index
    %4 = vector.load %arg3[%c0_2, %c0_3] : memref<16x32xf32, #tpu.memory_space<vmem>>, vector<16x32xf32>
    %c0_4 = arith.constant 0 : index
    %c0_5 = arith.constant 0 : index
    %5 = vector.load %arg4[%c0_4, %c0_5] : memref<32x32xf32, #tpu.memory_space<vmem>>, vector<32x32xf32>
    %cst = arith.constant dense<0.000000e+00> : vector<16x32xf32>
    %6 = tpu.matmul %4, %5, %cst {dimension_numbers = #tpu.dot_dimension_numbers<[1], [0], [0], [1], [0, 0, 1, 1], [], []>} : vector<16x32xf32>, vector<32x32xf32>, vector<16x32xf32> -> vector<16x32xf32>
    %7 = arith.addf %3, %6 : vector<16x32xf32>
    %c0_6 = arith.constant 0 : index
    %c0_7 = arith.constant 0 : index
    %8 = vector.load %arg7[%c0_6, %c0_7] : memref<16x32xf32, #tpu.memory_space<vmem>>, vector<16x32xf32>
    tpu.vector_store %arg7[%c0_6, %c0_7], %7 {strides = array<i32>} : memref<16x32xf32, #tpu.memory_space<vmem>>, vector<16x32xf32>,
    %c0_i32_8 = arith.constant 0 : i32
    %9 = arith.cmpi eq, %arg2, %c0_i32_8 : i32
    %10 = arith.extui %9 : i1 to i32
    %c0_i32_9 = arith.constant 0 : i32
    %11 = arith.cmpi ne, %10, %c0_i32_9 : i32
    scf.if %11 {
      %c0_10 = arith.constant 0 : index
      %c0_11 = arith.constant 0 : index
      %12 = vector.load %arg7[%c0_10, %c0_11] : memref<16x32xf32, #tpu.memory_space<vmem>>, vector<16x32xf32>
      %c0_12 = arith.constant 0 : index
      %c0_13 = arith.constant 0 : index
      %13 = vector.load %arg5[%c0_12, %c0_13] : memref<1x32xf32, #tpu.memory_space<vmem>>, vector<1x32xf32>
      %14 = vector.broadcast %13 : vector<1x32xf32> to vector<16x32xf32>
      %15 = arith.addf %12, %14 : vector<16x32xf32>
      %c0_14 = arith.constant 0 : index
      %c0_15 = arith.constant 0 : index
      %16 = vector.load %arg6[%c0_14, %c0_15] : memref<16x32xf32, #tpu.memory_space<vmem>>, vector<16x32xf32>
      tpu.vector_store %arg6[%c0_14, %c0_15], %15 {strides = array<i32>} : memref<16x32xf32, #tpu.memory_space<vmem>>, vector<16x32xf32>,
    } else {
    }
    return
  }
  func.func @transform_0(%arg0: i32, %arg1: i32, %arg2: i32) -> (i32, i32) {
    %c0_i32 = arith.constant 0 : i32
    return %arg0, %arg2 : i32, i32
  }
  func.func @transform_1(%arg0: i32, %arg1: i32, %arg2: i32) -> (i32, i32) {
    %c0_i32 = arith.constant 0 : i32
    return %arg2, %arg1 : i32, i32
  }
  func.func @transform_2(%arg0: i32, %arg1: i32, %arg2: i32) -> (i32, i32) {
    %c0_i32 = arith.constant 0 : i32
    %c0_i32_0 = arith.constant 0 : i32
    return %c0_i32, %arg1 : i32, i32
  }
  func.func @transform_3(%arg0: i32, %arg1: i32, %arg2: i32) -> (i32, i32) {
    %c0_i32 = arith.constant 0 : i32
    return %arg0, %arg1 : i32, i32
  }
}

module attributes {stable_mosaic.version = 11 : i64} {
  func.func @_qkv_linear_kernel(%arg0: i32, %arg1: i32, %arg2: i32, %arg3: memref<16x32xf32, #tpu.memory_space<vmem>>, %arg4: memref<32x32xf32, #tpu.memory_space<vmem>>, %arg5: memref<32x32xf32, #tpu.memory_space<vmem>>, %arg6: memref<32x32xf32, #tpu.memory_space<vmem>>, %arg7: memref<1x32xf32, #tpu.memory_space<vmem>>, %arg8: memref<1x32xf32, #tpu.memory_space<vmem>>, %arg9: memref<1x32xf32, #tpu.memory_space<vmem>>, %arg10: memref<16x32xf32, #tpu.memory_space<vmem>>, %arg11: memref<16x32xf32, #tpu.memory_space<vmem>>, %arg12: memref<16x32xf32, #tpu.memory_space<vmem>>, %arg13: memref<16x32xf32, #tpu.memory_space<vmem>>, %arg14: memref<16x32xf32, #tpu.memory_space<vmem>>, %arg15: memref<16x32xf32, #tpu.memory_space<vmem>>) attributes {dimension_semantics = [#tpu.dimension_semantics<parallel>, #tpu.dimension_semantics<parallel>, #tpu.dimension_semantics<arbitrary>], iteration_bounds = array<i64: 1, 1, 1>, scalar_prefetch = 0 : i64, scratch_operands = 3 : i64, tpu.core_type = #tpu.core_type<tc>, window_params = [{transform_indices = @transform_0, window_bounds = array<i64: 16, 32>}, {transform_indices = @transform_1, window_bounds = array<i64: 32, 32>}, {transform_indices = @transform_2, window_bounds = array<i64: 32, 32>}, {transform_indices = @transform_3, window_bounds = array<i64: 32, 32>}, {transform_indices = @transform_4, window_bounds = array<i64: 1, 32>}, {transform_indices = @transform_5, window_bounds = array<i64: 1, 32>}, {transform_indices = @transform_6, window_bounds = array<i64: 1, 32>}, {transform_indices = @transform_7, window_bounds = array<i64: 16, 32>}, {transform_indices = @transform_8, window_bounds = array<i64: 16, 32>}, {transform_indices = @transform_9, window_bounds = array<i64: 16, 32>}]} {
    %c0_i32 = arith.constant 0 : i32
    %0 = arith.cmpi eq, %arg2, %c0_i32 : i32
    %1 = arith.extui %0 : i1 to i32
    %c0_i32_0 = arith.constant 0 : i32
    %2 = arith.cmpi ne, %1, %c0_i32_0 : i32
    scf.if %2 {
      %cst_24 = arith.constant 0.000000e+00 : f32
      %22 = vector.broadcast %cst_24 : f32 to vector<16x32xf32>
      %c0_25 = arith.constant 0 : index
      %c0_26 = arith.constant 0 : index
      %23 = vector.load %arg13[%c0_25, %c0_26] : memref<16x32xf32, #tpu.memory_space<vmem>>, vector<16x32xf32>
      tpu.vector_store %arg13[%c0_25, %c0_26], %22 {strides = array<i32>} : memref<16x32xf32, #tpu.memory_space<vmem>>, vector<16x32xf32>,
      %cst_27 = arith.constant 0.000000e+00 : f32
      %24 = vector.broadcast %cst_27 : f32 to vector<16x32xf32>
      %c0_28 = arith.constant 0 : index
      %c0_29 = arith.constant 0 : index
      %25 = vector.load %arg14[%c0_28, %c0_29] : memref<16x32xf32, #tpu.memory_space<vmem>>, vector<16x32xf32>
      tpu.vector_store %arg14[%c0_28, %c0_29], %24 {strides = array<i32>} : memref<16x32xf32, #tpu.memory_space<vmem>>, vector<16x32xf32>,
      %cst_30 = arith.constant 0.000000e+00 : f32
      %26 = vector.broadcast %cst_30 : f32 to vector<16x32xf32>
      %c0_31 = arith.constant 0 : index
      %c0_32 = arith.constant 0 : index
      %27 = vector.load %arg15[%c0_31, %c0_32] : memref<16x32xf32, #tpu.memory_space<vmem>>, vector<16x32xf32>
      tpu.vector_store %arg15[%c0_31, %c0_32], %26 {strides = array<i32>} : memref<16x32xf32, #tpu.memory_space<vmem>>, vector<16x32xf32>,
    } else {
    }
    %c0 = arith.constant 0 : index
    %c0_1 = arith.constant 0 : index
    %3 = vector.load %arg3[%c0, %c0_1] : memref<16x32xf32, #tpu.memory_space<vmem>>, vector<16x32xf32>
    %c0_2 = arith.constant 0 : index
    %c0_3 = arith.constant 0 : index
    %4 = vector.load %arg13[%c0_2, %c0_3] : memref<16x32xf32, #tpu.memory_space<vmem>>, vector<16x32xf32>
    %c0_4 = arith.constant 0 : index
    %c0_5 = arith.constant 0 : index
    %5 = vector.load %arg4[%c0_4, %c0_5] : memref<32x32xf32, #tpu.memory_space<vmem>>, vector<32x32xf32>
    %cst = arith.constant dense<0.000000e+00> : vector<16x32xf32>
    %6 = tpu.matmul %3, %5, %cst {dimension_numbers = #tpu.dot_dimension_numbers<[1], [0], [0], [1], [0, 0, 1, 1], [], []>} : vector<16x32xf32>, vector<32x32xf32>, vector<16x32xf32> -> vector<16x32xf32>
    %7 = arith.addf %4, %6 : vector<16x32xf32>
    %c0_6 = arith.constant 0 : index
    %c0_7 = arith.constant 0 : index
    %8 = vector.load %arg13[%c0_6, %c0_7] : memref<16x32xf32, #tpu.memory_space<vmem>>, vector<16x32xf32>
    tpu.vector_store %arg13[%c0_6, %c0_7], %7 {strides = array<i32>} : memref<16x32xf32, #tpu.memory_space<vmem>>, vector<16x32xf32>,
    %c0_8 = arith.constant 0 : index
    %c0_9 = arith.constant 0 : index
    %9 = vector.load %arg14[%c0_8, %c0_9] : memref<16x32xf32, #tpu.memory_space<vmem>>, vector<16x32xf32>
    %c0_10 = arith.constant 0 : index
    %c0_11 = arith.constant 0 : index
    %10 = vector.load %arg5[%c0_10, %c0_11] : memref<32x32xf32, #tpu.memory_space<vmem>>, vector<32x32xf32>
    %cst_12 = arith.constant dense<0.000000e+00> : vector<16x32xf32>
    %11 = tpu.matmul %3, %10, %cst_12 {dimension_numbers = #tpu.dot_dimension_numbers<[1], [0], [0], [1], [0, 0, 1, 1], [], []>} : vector<16x32xf32>, vector<32x32xf32>, vector<16x32xf32> -> vector<16x32xf32>
    %12 = arith.addf %9, %11 : vector<16x32xf32>
    %c0_13 = arith.constant 0 : index
    %c0_14 = arith.constant 0 : index
    %13 = vector.load %arg14[%c0_13, %c0_14] : memref<16x32xf32, #tpu.memory_space<vmem>>, vector<16x32xf32>
    tpu.vector_store %arg14[%c0_13, %c0_14], %12 {strides = array<i32>} : memref<16x32xf32, #tpu.memory_space<vmem>>, vector<16x32xf32>,
    %c0_15 = arith.constant 0 : index
    %c0_16 = arith.constant 0 : index
    %14 = vector.load %arg15[%c0_15, %c0_16] : memref<16x32xf32, #tpu.memory_space<vmem>>, vector<16x32xf32>
    %c0_17 = arith.constant 0 : index
    %c0_18 = arith.constant 0 : index
    %15 = vector.load %arg6[%c0_17, %c0_18] : memref<32x32xf32, #tpu.memory_space<vmem>>, vector<32x32xf32>
    %cst_19 = arith.constant dense<0.000000e+00> : vector<16x32xf32>
    %16 = tpu.matmul %3, %15, %cst_19 {dimension_numbers = #tpu.dot_dimension_numbers<[1], [0], [0], [1], [0, 0, 1, 1], [], []>} : vector<16x32xf32>, vector<32x32xf32>, vector<16x32xf32> -> vector<16x32xf32>
    %17 = arith.addf %14, %16 : vector<16x32xf32>
    %c0_20 = arith.constant 0 : index
    %c0_21 = arith.constant 0 : index
    %18 = vector.load %arg15[%c0_20, %c0_21] : memref<16x32xf32, #tpu.memory_space<vmem>>, vector<16x32xf32>
    tpu.vector_store %arg15[%c0_20, %c0_21], %17 {strides = array<i32>} : memref<16x32xf32, #tpu.memory_space<vmem>>, vector<16x32xf32>,
    %c0_i32_22 = arith.constant 0 : i32
    %19 = arith.cmpi eq, %arg2, %c0_i32_22 : i32
    %20 = arith.extui %19 : i1 to i32
    %c0_i32_23 = arith.constant 0 : i32
    %21 = arith.cmpi ne, %20, %c0_i32_23 : i32
    scf.if %21 {
      %c0_24 = arith.constant 0 : index
      %c0_25 = arith.constant 0 : index
      %22 = vector.load %arg13[%c0_24, %c0_25] : memref<16x32xf32, #tpu.memory_space<vmem>>, vector<16x32xf32>
      %c0_26 = arith.constant 0 : index
      %c0_27 = arith.constant 0 : index
      %23 = vector.load %arg7[%c0_26, %c0_27] : memref<1x32xf32, #tpu.memory_space<vmem>>, vector<1x32xf32>
      %24 = vector.broadcast %23 : vector<1x32xf32> to vector<16x32xf32>
      %25 = arith.addf %22, %24 : vector<16x32xf32>
      %c0_28 = arith.constant 0 : index
      %c0_29 = arith.constant 0 : index
      %26 = vector.load %arg10[%c0_28, %c0_29] : memref<16x32xf32, #tpu.memory_space<vmem>>, vector<16x32xf32>
      tpu.vector_store %arg10[%c0_28, %c0_29], %25 {strides = array<i32>} : memref<16x32xf32, #tpu.memory_space<vmem>>, vector<16x32xf32>,
      %c0_30 = arith.constant 0 : index
      %c0_31 = arith.constant 0 : index
      %27 = vector.load %arg14[%c0_30, %c0_31] : memref<16x32xf32, #tpu.memory_space<vmem>>, vector<16x32xf32>
      %c0_32 = arith.constant 0 : index
      %c0_33 = arith.constant 0 : index
      %28 = vector.load %arg8[%c0_32, %c0_33] : memref<1x32xf32, #tpu.memory_space<vmem>>, vector<1x32xf32>
      %29 = vector.broadcast %28 : vector<1x32xf32> to vector<16x32xf32>
      %30 = arith.addf %27, %29 : vector<16x32xf32>
      %c0_34 = arith.constant 0 : index
      %c0_35 = arith.constant 0 : index
      %31 = vector.load %arg11[%c0_34, %c0_35] : memref<16x32xf32, #tpu.memory_space<vmem>>, vector<16x32xf32>
      tpu.vector_store %arg11[%c0_34, %c0_35], %30 {strides = array<i32>} : memref<16x32xf32, #tpu.memory_space<vmem>>, vector<16x32xf32>,
      %c0_36 = arith.constant 0 : index
      %c0_37 = arith.constant 0 : index
      %32 = vector.load %arg15[%c0_36, %c0_37] : memref<16x32xf32, #tpu.memory_space<vmem>>, vector<16x32xf32>
      %c0_38 = arith.constant 0 : index
      %c0_39 = arith.constant 0 : index
      %33 = vector.load %arg9[%c0_38, %c0_39] : memref<1x32xf32, #tpu.memory_space<vmem>>, vector<1x32xf32>
      %34 = vector.broadcast %33 : vector<1x32xf32> to vector<16x32xf32>
      %35 = arith.addf %32, %34 : vector<16x32xf32>
      %c0_40 = arith.constant 0 : index
      %c0_41 = arith.constant 0 : index
      %36 = vector.load %arg12[%c0_40, %c0_41] : memref<16x32xf32, #tpu.memory_space<vmem>>, vector<16x32xf32>
      tpu.vector_store %arg12[%c0_40, %c0_41], %35 {strides = array<i32>} : memref<16x32xf32, #tpu.memory_space<vmem>>, vector<16x32xf32>,
    } else {
    }
    return
  }
  func.func @transform_0(%arg0: i32, %arg1: i32, %arg2: i32) -> (i32, i32) {
    %c0_i32 = arith.constant 0 : i32
    return %arg0, %arg2 : i32, i32
  }
  func.func @transform_1(%arg0: i32, %arg1: i32, %arg2: i32) -> (i32, i32) {
    %c0_i32 = arith.constant 0 : i32
    return %arg2, %arg1 : i32, i32
  }
  func.func @transform_2(%arg0: i32, %arg1: i32, %arg2: i32) -> (i32, i32) {
    %c0_i32 = arith.constant 0 : i32
    return %arg2, %arg1 : i32, i32
  }
  func.func @transform_3(%arg0: i32, %arg1: i32, %arg2: i32) -> (i32, i32) {
    %c0_i32 = arith.constant 0 : i32
    return %arg2, %arg1 : i32, i32
  }
  func.func @transform_4(%arg0: i32, %arg1: i32, %arg2: i32) -> (i32, i32) {
    %c0_i32 = arith.constant 0 : i32
    %c0_i32_0 = arith.constant 0 : i32
    return %c0_i32, %arg1 : i32, i32
  }
  func.func @transform_5(%arg0: i32, %arg1: i32, %arg2: i32) -> (i32, i32) {
    %c0_i32 = arith.constant 0 : i32
    %c0_i32_0 = arith.constant 0 : i32
    return %c0_i32, %arg1 : i32, i32
  }
  func.func @transform_6(%arg0: i32, %arg1: i32, %arg2: i32) -> (i32, i32) {
    %c0_i32 = arith.constant 0 : i32
    %c0_i32_0 = arith.constant 0 : i32
    return %c0_i32, %arg1 : i32, i32
  }
  func.func @transform_7(%arg0: i32, %arg1: i32, %arg2: i32) -> (i32, i32) {
    %c0_i32 = arith.constant 0 : i32
    return %arg0, %arg1 : i32, i32
  }
  func.func @transform_8(%arg0: i32, %arg1: i32, %arg2: i32) -> (i32, i32) {
    %c0_i32 = arith.constant 0 : i32
    return %arg0, %arg1 : i32, i32
  }
  func.func @transform_9(%arg0: i32, %arg1: i32, %arg2: i32) -> (i32, i32) {
    %c0_i32 = arith.constant 0 : i32
    return %arg0, %arg1 : i32, i32
  }
}

module attributes {stable_mosaic.version = 11 : i64} {
  func.func @_attn_kernel(%arg0: i32, %arg1: i32, %arg2: memref<8x1x1x32xf32, #tpu.memory_space<vmem>>, %arg3: memref<8x1x1x32xf32, #tpu.memory_space<vmem>>, %arg4: memref<8x1x1x32xf32, #tpu.memory_space<vmem>>, %arg5: memref<8x1x1x32xf32, #tpu.memory_space<vmem>>, %arg6: memref<1x8x8xf32, #tpu.memory_space<vmem>>) attributes {dimension_semantics = [#tpu.dimension_semantics<parallel>, #tpu.dimension_semantics<parallel>], iteration_bounds = array<i64: 2, 1>, scalar_prefetch = 0 : i64, scratch_operands = 0 : i64, tpu.core_type = #tpu.core_type<tc>, window_params = [{transform_indices = @transform_0, window_bounds = array<i64: 8, 1, 1, 32>}, {transform_indices = @transform_1, window_bounds = array<i64: 8, 1, 1, 32>}, {transform_indices = @transform_2, window_bounds = array<i64: 8, 1, 1, 32>}, {transform_indices = @transform_3, window_bounds = array<i64: 8, 1, 1, 32>}, {transform_indices = @transform_4, window_bounds = array<i64: 1, 8, 8>}]} {
    %cst = arith.constant 0.000000e+00 : f32
    %0 = vector.broadcast %cst : f32 to vector<8x8xf32>
    %c0 = arith.constant 0 : index
    %c0_0 = arith.constant 0 : index
    %c0_1 = arith.constant 0 : index
    %c0_2 = arith.constant 0 : index
    %1 = vector.load %arg2[%c0, %c0_0, %c0_1, %c0_2] : memref<8x1x1x32xf32, #tpu.memory_space<vmem>>, vector<8x1x1x8xf32>
    %2 = vector.shape_cast %1 : vector<8x1x1x8xf32> to vector<8x8xf32>
    %c0_3 = arith.constant 0 : index
    %c0_4 = arith.constant 0 : index
    %c0_5 = arith.constant 0 : index
    %c0_6 = arith.constant 0 : index
    %3 = vector.load %arg3[%c0_3, %c0_4, %c0_5, %c0_6] : memref<8x1x1x32xf32, #tpu.memory_space<vmem>>, vector<8x1x1x8xf32>
    %4 = vector.shape_cast %3 : vector<8x1x1x8xf32> to vector<8x8xf32>
    %c0_7 = arith.constant 0 : index
    %c0_8 = arith.constant 0 : index
    %c0_9 = arith.constant 0 : index
    %c0_10 = arith.constant 0 : index
    %5 = vector.load %arg4[%c0_7, %c0_8, %c0_9, %c0_10] : memref<8x1x1x32xf32, #tpu.memory_space<vmem>>, vector<8x1x1x8xf32>
    %6 = vector.shape_cast %5 : vector<8x1x1x8xf32> to vector<8x8xf32>
    %cst_11 = arith.constant dense<0.000000e+00> : vector<8x8xf32>
    %7 = tpu.matmul %2, %4, %cst_11 {dimension_numbers = #tpu.dot_dimension_numbers<[1], [1], [0], [0], [0, 0, 1, 0], [], []>} : vector<8x8xf32>, vector<8x8xf32>, vector<8x8xf32> -> vector<8x8xf32>
    %cst_12 = arith.constant dense<0xFF800000> : vector<8xf32>
    %8 = vector.multi_reduction <maximumf>, %7, %cst_12 [1] : vector<8x8xf32> to vector<8xf32>
    %9 = vector.shape_cast %8 : vector<8xf32> to vector<8x1xf32>
    %10 = vector.broadcast %9 : vector<8x1xf32> to vector<8x8xf32>
    %11 = arith.subf %7, %10 : vector<8x8xf32>
    %12 = math.exp %11 : vector<8x8xf32>
    %cst_13 = arith.constant dense<0.000000e+00> : vector<8xf32>
    %13 = vector.multi_reduction <add>, %12, %cst_13 [1] : vector<8x8xf32> to vector<8xf32>
    %14 = vector.shape_cast %13 : vector<8xf32> to vector<8x1xf32>
    %15 = tpu.reciprocal %14 {approx = true} : vector<8x1xf32> -> vector<8x1xf32>
    %16 = vector.broadcast %15 : vector<8x1xf32> to vector<8x8xf32>
    %17 = arith.mulf %12, %16 : vector<8x8xf32>
    %18 = arith.addf %0, %17 : vector<8x8xf32>
    %cst_14 = arith.constant dense<0.000000e+00> : vector<8x8xf32>
    %19 = tpu.matmul %17, %6, %cst_14 {dimension_numbers = #tpu.dot_dimension_numbers<[1], [0], [0], [1], [0, 0, 1, 1], [], []>} : vector<8x8xf32>, vector<8x8xf32>, vector<8x8xf32> -> vector<8x8xf32>
    %c0_15 = arith.constant 0 : index
    %c0_16 = arith.constant 0 : index
    %c0_17 = arith.constant 0 : index
    %c0_18 = arith.constant 0 : index
    %20 = vector.load %arg5[%c0_15, %c0_16, %c0_17, %c0_18] : memref<8x1x1x32xf32, #tpu.memory_space<vmem>>, vector<8x1x1x8xf32>
    %21 = vector.shape_cast %20 : vector<8x1x1x8xf32> to vector<8x8xf32>
    %22 = vector.shape_cast %19 : vector<8x8xf32> to vector<8x1x1x8xf32>
    tpu.vector_store %arg5[%c0_15, %c0_16, %c0_17, %c0_18], %22 {strides = array<i32>} : memref<8x1x1x32xf32, #tpu.memory_space<vmem>>, vector<8x1x1x8xf32>,
    %c0_19 = arith.constant 0 : index
    %c0_20 = arith.constant 0 : index
    %c0_21 = arith.constant 0 : index
    %c8 = arith.constant 8 : index
    %23 = vector.load %arg2[%c0_19, %c0_20, %c0_21, %c8] : memref<8x1x1x32xf32, #tpu.memory_space<vmem>>, vector<8x1x1x8xf32>
    %24 = vector.shape_cast %23 : vector<8x1x1x8xf32> to vector<8x8xf32>
    %c0_22 = arith.constant 0 : index
    %c0_23 = arith.constant 0 : index
    %c0_24 = arith.constant 0 : index
    %c8_25 = arith.constant 8 : index
    %25 = vector.load %arg3[%c0_22, %c0_23, %c0_24, %c8_25] : memref<8x1x1x32xf32, #tpu.memory_space<vmem>>, vector<8x1x1x8xf32>
    %26 = vector.shape_cast %25 : vector<8x1x1x8xf32> to vector<8x8xf32>
    %c0_26 = arith.constant 0 : index
    %c0_27 = arith.constant 0 : index
    %c0_28 = arith.constant 0 : index
    %c8_29 = arith.constant 8 : index
    %27 = vector.load %arg4[%c0_26, %c0_27, %c0_28, %c8_29] : memref<8x1x1x32xf32, #tpu.memory_space<vmem>>, vector<8x1x1x8xf32>
    %28 = vector.shape_cast %27 : vector<8x1x1x8xf32> to vector<8x8xf32>
    %cst_30 = arith.constant dense<0.000000e+00> : vector<8x8xf32>
    %29 = tpu.matmul %24, %26, %cst_30 {dimension_numbers = #tpu.dot_dimension_numbers<[1], [1], [0], [0], [0, 0, 1, 0], [], []>} : vector<8x8xf32>, vector<8x8xf32>, vector<8x8xf32> -> vector<8x8xf32>
    %cst_31 = arith.constant dense<0xFF800000> : vector<8xf32>
    %30 = vector.multi_reduction <maximumf>, %29, %cst_31 [1] : vector<8x8xf32> to vector<8xf32>
    %31 = vector.shape_cast %30 : vector<8xf32> to vector<8x1xf32>
    %32 = vector.broadcast %31 : vector<8x1xf32> to vector<8x8xf32>
    %33 = arith.subf %29, %32 : vector<8x8xf32>
    %34 = math.exp %33 : vector<8x8xf32>
    %cst_32 = arith.constant dense<0.000000e+00> : vector<8xf32>
    %35 = vector.multi_reduction <add>, %34, %cst_32 [1] : vector<8x8xf32> to vector<8xf32>
    %36 = vector.shape_cast %35 : vector<8xf32> to vector<8x1xf32>
    %37 = tpu.reciprocal %36 {approx = true} : vector<8x1xf32> -> vector<8x1xf32>
    %38 = vector.broadcast %37 : vector<8x1xf32> to vector<8x8xf32>
    %39 = arith.mulf %34, %38 : vector<8x8xf32>
    %40 = arith.addf %18, %39 : vector<8x8xf32>
    %cst_33 = arith.constant dense<0.000000e+00> : vector<8x8xf32>
    %41 = tpu.matmul %39, %28, %cst_33 {dimension_numbers = #tpu.dot_dimension_numbers<[1], [0], [0], [1], [0, 0, 1, 1], [], []>} : vector<8x8xf32>, vector<8x8xf32>, vector<8x8xf32> -> vector<8x8xf32>
    %c0_34 = arith.constant 0 : index
    %c0_35 = arith.constant 0 : index
    %c0_36 = arith.constant 0 : index
    %c8_37 = arith.constant 8 : index
    %42 = vector.load %arg5[%c0_34, %c0_35, %c0_36, %c8_37] : memref<8x1x1x32xf32, #tpu.memory_space<vmem>>, vector<8x1x1x8xf32>
    %43 = vector.shape_cast %42 : vector<8x1x1x8xf32> to vector<8x8xf32>
    %44 = vector.shape_cast %41 : vector<8x8xf32> to vector<8x1x1x8xf32>
    tpu.vector_store %arg5[%c0_34, %c0_35, %c0_36, %c8_37], %44 {strides = array<i32>} : memref<8x1x1x32xf32, #tpu.memory_space<vmem>>, vector<8x1x1x8xf32>,
    %c0_38 = arith.constant 0 : index
    %c0_39 = arith.constant 0 : index
    %c0_40 = arith.constant 0 : index
    %c16 = arith.constant 16 : index
    %45 = vector.load %arg2[%c0_38, %c0_39, %c0_40, %c16] : memref<8x1x1x32xf32, #tpu.memory_space<vmem>>, vector<8x1x1x8xf32>
    %46 = vector.shape_cast %45 : vector<8x1x1x8xf32> to vector<8x8xf32>
    %c0_41 = arith.constant 0 : index
    %c0_42 = arith.constant 0 : index
    %c0_43 = arith.constant 0 : index
    %c16_44 = arith.constant 16 : index
    %47 = vector.load %arg3[%c0_41, %c0_42, %c0_43, %c16_44] : memref<8x1x1x32xf32, #tpu.memory_space<vmem>>, vector<8x1x1x8xf32>
    %48 = vector.shape_cast %47 : vector<8x1x1x8xf32> to vector<8x8xf32>
    %c0_45 = arith.constant 0 : index
    %c0_46 = arith.constant 0 : index
    %c0_47 = arith.constant 0 : index
    %c16_48 = arith.constant 16 : index
    %49 = vector.load %arg4[%c0_45, %c0_46, %c0_47, %c16_48] : memref<8x1x1x32xf32, #tpu.memory_space<vmem>>, vector<8x1x1x8xf32>
    %50 = vector.shape_cast %49 : vector<8x1x1x8xf32> to vector<8x8xf32>
    %cst_49 = arith.constant dense<0.000000e+00> : vector<8x8xf32>
    %51 = tpu.matmul %46, %48, %cst_49 {dimension_numbers = #tpu.dot_dimension_numbers<[1], [1], [0], [0], [0, 0, 1, 0], [], []>} : vector<8x8xf32>, vector<8x8xf32>, vector<8x8xf32> -> vector<8x8xf32>
    %cst_50 = arith.constant dense<0xFF800000> : vector<8xf32>
    %52 = vector.multi_reduction <maximumf>, %51, %cst_50 [1] : vector<8x8xf32> to vector<8xf32>
    %53 = vector.shape_cast %52 : vector<8xf32> to vector<8x1xf32>
    %54 = vector.broadcast %53 : vector<8x1xf32> to vector<8x8xf32>
    %55 = arith.subf %51, %54 : vector<8x8xf32>
    %56 = math.exp %55 : vector<8x8xf32>
    %cst_51 = arith.constant dense<0.000000e+00> : vector<8xf32>
    %57 = vector.multi_reduction <add>, %56, %cst_51 [1] : vector<8x8xf32> to vector<8xf32>
    %58 = vector.shape_cast %57 : vector<8xf32> to vector<8x1xf32>
    %59 = tpu.reciprocal %58 {approx = true} : vector<8x1xf32> -> vector<8x1xf32>
    %60 = vector.broadcast %59 : vector<8x1xf32> to vector<8x8xf32>
    %61 = arith.mulf %56, %60 : vector<8x8xf32>
    %62 = arith.addf %40, %61 : vector<8x8xf32>
    %cst_52 = arith.constant dense<0.000000e+00> : vector<8x8xf32>
    %63 = tpu.matmul %61, %50, %cst_52 {dimension_numbers = #tpu.dot_dimension_numbers<[1], [0], [0], [1], [0, 0, 1, 1], [], []>} : vector<8x8xf32>, vector<8x8xf32>, vector<8x8xf32> -> vector<8x8xf32>
    %c0_53 = arith.constant 0 : index
    %c0_54 = arith.constant 0 : index
    %c0_55 = arith.constant 0 : index
    %c16_56 = arith.constant 16 : index
    %64 = vector.load %arg5[%c0_53, %c0_54, %c0_55, %c16_56] : memref<8x1x1x32xf32, #tpu.memory_space<vmem>>, vector<8x1x1x8xf32>
    %65 = vector.shape_cast %64 : vector<8x1x1x8xf32> to vector<8x8xf32>
    %66 = vector.shape_cast %63 : vector<8x8xf32> to vector<8x1x1x8xf32>
    tpu.vector_store %arg5[%c0_53, %c0_54, %c0_55, %c16_56], %66 {strides = array<i32>} : memref<8x1x1x32xf32, #tpu.memory_space<vmem>>, vector<8x1x1x8xf32>,
    %c0_57 = arith.constant 0 : index
    %c0_58 = arith.constant 0 : index
    %c0_59 = arith.constant 0 : index
    %c24 = arith.constant 24 : index
    %67 = vector.load %arg2[%c0_57, %c0_58, %c0_59, %c24] : memref<8x1x1x32xf32, #tpu.memory_space<vmem>>, vector<8x1x1x8xf32>
    %68 = vector.shape_cast %67 : vector<8x1x1x8xf32> to vector<8x8xf32>
    %c0_60 = arith.constant 0 : index
    %c0_61 = arith.constant 0 : index
    %c0_62 = arith.constant 0 : index
    %c24_63 = arith.constant 24 : index
    %69 = vector.load %arg3[%c0_60, %c0_61, %c0_62, %c24_63] : memref<8x1x1x32xf32, #tpu.memory_space<vmem>>, vector<8x1x1x8xf32>
    %70 = vector.shape_cast %69 : vector<8x1x1x8xf32> to vector<8x8xf32>
    %c0_64 = arith.constant 0 : index
    %c0_65 = arith.constant 0 : index
    %c0_66 = arith.constant 0 : index
    %c24_67 = arith.constant 24 : index
    %71 = vector.load %arg4[%c0_64, %c0_65, %c0_66, %c24_67] : memref<8x1x1x32xf32, #tpu.memory_space<vmem>>, vector<8x1x1x8xf32>
    %72 = vector.shape_cast %71 : vector<8x1x1x8xf32> to vector<8x8xf32>
    %cst_68 = arith.constant dense<0.000000e+00> : vector<8x8xf32>
    %73 = tpu.matmul %68, %70, %cst_68 {dimension_numbers = #tpu.dot_dimension_numbers<[1], [1], [0], [0], [0, 0, 1, 0], [], []>} : vector<8x8xf32>, vector<8x8xf32>, vector<8x8xf32> -> vector<8x8xf32>
    %cst_69 = arith.constant dense<0xFF800000> : vector<8xf32>
    %74 = vector.multi_reduction <maximumf>, %73, %cst_69 [1] : vector<8x8xf32> to vector<8xf32>
    %75 = vector.shape_cast %74 : vector<8xf32> to vector<8x1xf32>
    %76 = vector.broadcast %75 : vector<8x1xf32> to vector<8x8xf32>
    %77 = arith.subf %73, %76 : vector<8x8xf32>
    %78 = math.exp %77 : vector<8x8xf32>
    %cst_70 = arith.constant dense<0.000000e+00> : vector<8xf32>
    %79 = vector.multi_reduction <add>, %78, %cst_70 [1] : vector<8x8xf32> to vector<8xf32>
    %80 = vector.shape_cast %79 : vector<8xf32> to vector<8x1xf32>
    %81 = tpu.reciprocal %80 {approx = true} : vector<8x1xf32> -> vector<8x1xf32>
    %82 = vector.broadcast %81 : vector<8x1xf32> to vector<8x8xf32>
    %83 = arith.mulf %78, %82 : vector<8x8xf32>
    %84 = arith.addf %62, %83 : vector<8x8xf32>
    %cst_71 = arith.constant dense<0.000000e+00> : vector<8x8xf32>
    %85 = tpu.matmul %83, %72, %cst_71 {dimension_numbers = #tpu.dot_dimension_numbers<[1], [0], [0], [1], [0, 0, 1, 1], [], []>} : vector<8x8xf32>, vector<8x8xf32>, vector<8x8xf32> -> vector<8x8xf32>
    %c0_72 = arith.constant 0 : index
    %c0_73 = arith.constant 0 : index
    %c0_74 = arith.constant 0 : index
    %c24_75 = arith.constant 24 : index
    %86 = vector.load %arg5[%c0_72, %c0_73, %c0_74, %c24_75] : memref<8x1x1x32xf32, #tpu.memory_space<vmem>>, vector<8x1x1x8xf32>
    %87 = vector.shape_cast %86 : vector<8x1x1x8xf32> to vector<8x8xf32>
    %88 = vector.shape_cast %85 : vector<8x8xf32> to vector<8x1x1x8xf32>
    tpu.vector_store %arg5[%c0_72, %c0_73, %c0_74, %c24_75], %88 {strides = array<i32>} : memref<8x1x1x32xf32, #tpu.memory_space<vmem>>, vector<8x1x1x8xf32>,
    %cst_76 = arith.constant 2.500000e-01 : f32
    %89 = vector.broadcast %cst_76 : f32 to vector<8x8xf32>
    %90 = arith.mulf %84, %89 : vector<8x8xf32>
    %c0_77 = arith.constant 0 : index
    %c0_78 = arith.constant 0 : index
    %c0_79 = arith.constant 0 : index
    %91 = vector.load %arg6[%c0_77, %c0_78, %c0_79] : memref<1x8x8xf32, #tpu.memory_space<vmem>>, vector<1x8x8xf32>
    %92 = vector.shape_cast %91 : vector<1x8x8xf32> to vector<8x8xf32>
    %93 = vector.shape_cast %90 : vector<8x8xf32> to vector<1x8x8xf32>
    tpu.vector_store %arg6[%c0_77, %c0_78, %c0_79], %93 {strides = array<i32>} : memref<1x8x8xf32, #tpu.memory_space<vmem>>, vector<1x8x8xf32>,
    return
  }
  func.func @transform_0(%arg0: i32, %arg1: i32) -> (i32, i32, i32, i32) {
    %c0_i32 = arith.constant 0 : i32
    %c0_i32_0 = arith.constant 0 : i32
    %c0_i32_1 = arith.constant 0 : i32
    return %arg1, %arg0, %c0_i32, %c0_i32_0 : i32, i32, i32, i32
  }
  func.func @transform_1(%arg0: i32, %arg1: i32) -> (i32, i32, i32, i32) {
    %c0_i32 = arith.constant 0 : i32
    %c0_i32_0 = arith.constant 0 : i32
    %c0_i32_1 = arith.constant 0 : i32
    %c0_i32_2 = arith.constant 0 : i32
    return %c0_i32, %arg0, %c0_i32_0, %c0_i32_1 : i32, i32, i32, i32
  }
  func.func @transform_2(%arg0: i32, %arg1: i32) -> (i32, i32, i32, i32) {
    %c0_i32 = arith.constant 0 : i32
    %c0_i32_0 = arith.constant 0 : i32
    %c0_i32_1 = arith.constant 0 : i32
    %c0_i32_2 = arith.constant 0 : i32
    return %c0_i32, %arg0, %c0_i32_0, %c0_i32_1 : i32, i32, i32, i32
  }
  func.func @transform_3(%arg0: i32, %arg1: i32) -> (i32, i32, i32, i32) {
    %c0_i32 = arith.constant 0 : i32
    %c0_i32_0 = arith.constant 0 : i32
    %c0_i32_1 = arith.constant 0 : i32
    return %arg1, %arg0, %c0_i32, %c0_i32_0 : i32, i32, i32, i32
  }
  func.func @transform_4(%arg0: i32, %arg1: i32) -> (i32, i32, i32) {
    %c0_i32 = arith.constant 0 : i32
    %c0_i32_0 = arith.constant 0 : i32
    return %arg0, %arg1, %c0_i32 : i32, i32, i32
  }
}

</mosaic_0001>

<bundles_post_ra>
// kernel: multihead_attention_forward.5
= control target key start
LH: loop header
LB: loop body
LE: loop exit
PB: predicated region body
PF: predicated region fallthrough
CT: control target
= control target key end

     0   :  { %vm19_vm0 = vcmask 261120   ;;  %v194_v3 = vmov 0.0   ;;  %s250_s0 = inlined_call_operand.vmem [shape: f32[16,32], index: 0, kind: input, shape index: {}]   ;;  %s251_s1 = inlined_call_operand.vmem [shape: f32[32,32], index: 1, kind: input, shape index: {}]   ;;  %s252_s2 = inlined_call_operand.vmem [shape: f32[1,32], index: 2, kind: input, shape index: {}]   ;;  %s253_s3 = inlined_call_operand.hbm [shape: f32[16,32], index: 3, kind: output, shape index: {}]  }
   0x1   :  { %v29_v0 = vld [vmem:[%s251_s1 + $0x18] sm:$0xff]  ;;  %v28_v1 = vld [vmem:[%s251_s1 + $0x10] sm:$0xff]  ;;  %v24_v2 = vld [vmem:[%s250_s0] sm:$0xff]  ;;  %21 = vst.msk [vmem:[#allocation2 + $0x8] sm:$0xff] %vm19_vm0, %v194_v3 }
   0x2   :  { %157 = vmatprep.subr.mxu0 %v29_v0  ;;  %20 = vst.msk [vmem:[#allocation2] sm:$0xff] %vm19_vm0, %v194_v3  ;;  %v27_v4 = vld [vmem:[%s251_s1 + $0x8] sm:$0xff]  ;;  %165 = vmatprep.mubr.msk.f32.mxu0 %vm19_vm0, %v24_v2 }
   0x3   :  { %158 = vmatpush3.msra.mxu0 %v29_v0 }
   0x4   :  { %8 = vsyncpa [#allocation4], 0  ;;  %159 = vmatprep.subr.mxu0 %v28_v1  ;;  %v26_v5 = vld [vmem:[%s251_s1] sm:$0xff]  ;;  %v25_v6 = vld [vmem:[%s250_s0 + $0x8] sm:$0xff]  ;;  %s195_s25 = smov [#allocation3]  }
   0x5   :  { %160 = vmatpush3.msra.mxu0 %v28_v1  ;;  %v150_v13 = vld [vmem:[%s252_s2] ss:$0 sm:$0xff]  ;;  %s137_s0 = sshll.u32 %s195_s25, 4  ;;  %s138_s0 = int_to_ptr.vmem [resolvable:$true] %s137_s0 }
   0x6   :  { %161 = vmatprep.subr.mxu0 %v27_v4  ;;  %s172_s26 = scalar_lea.vmem %s138_s0, 256  ;;  %p177_p1 = scmp.lt.s32.totalorder %s138_s0, %s138_s0 }
   0x7   :  { %162 = vmatpush3.msra.mxu0 %v27_v4  ;;  %p173_p0 = scmp.ne.s32.totalorder %s138_s0, %s172_s26  ;;  %p178_p2 = scmp.lt.s32.totalorder %s172_s26, %s172_s26 }
   0x8   :  { %163 = vmatprep.subr.mxu0 %v26_v5  ;;  %v23_v7 = vld [vmem:[#allocation2 + $0x8] sm:$0xff] }
   0x9   :  { %164 = vmatpush3.msra.mxu0 %v26_v5  ;;  %v22_v9 = vld [vmem:[#allocation2] sm:$0xff]  ;;  %p179_p3 = por %p178_p2, %p177_p1 }
   0xa   :  { %166 = vmatmul.mubr.msk.f32.vlgmr.msra.gmra.mxu0 %vm19_vm0, %v25_v6 }
   0xb   :  { %p180_p4 = pnand %p179_p3, %p173_p0 }
  0xca   :  { %v167_v8 = vpop.f32.mrf.mxu0 }
  0xcb   :  { %v113_v10 = vadd.f32 %v167_v8, %v23_v7 }
  0xcc   :  { %v103_v11 = vpop.f32.mrf.mxu0 }
  0xcd   :  { %115 = vst.msk [vmem:[#allocation2 + $0x8] sm:$0xff] %vm19_vm0, %v113_v10  ;;  %v112_v12 = vadd.f32 %v103_v11, %v22_v9 }
  0xcf   :  { %114 = vst.msk [vmem:[#allocation2] sm:$0xff] %vm19_vm0, %v112_v12 }
  0xd4   :  { %v120_v14 = vld [vmem:[#allocation2 + $0x8] sm:$0xff] }
  0xd5   :  { %v129_v15 = vadd.f32 %v150_v13, %v120_v14 }
  0xd6   :  { %v119_v16 = vld [vmem:[#allocation2] sm:$0xff] }
  0xd7   :  { %v128_v17 = vadd.f32 %v150_v13, %v119_v16  ;;  %131 = vst.msk [vmem:[#allocation3 + $0x8] sm:$0xff] %vm19_vm0, %v129_v15 }
  0xd9   :  { %130 = vst.msk [vmem:[#allocation3] sm:$0xff] %vm19_vm0, %v128_v17 }
  0xda   :  { %183 = shalt.err (!%p180_p4)
}
  0xdb   :  { %s196_s27 = smov 128   ;;  %s197_s2 = smov 8  }
  0xdc   :  { %143 = dma.vmem_to_hbm [thread:$0]  %s138_s0, 256, %s253_s3, [#allocation4], %s196_s27, %s196_s27, %s197_s2  }
  0xdd   :  { %192 = dma.done.wait [#allocation4], 256  }
  0xde   :  { %193 = vsyncadd [#allocation4], 4294967040 }
  0xdf   :  { %147 = vsyncpa [#allocation4], 1 }

// kernel: multihead_attention_forward.3
= control target key start
LH: loop header
LB: loop body
LE: loop exit
PB: predicated region body
PF: predicated region fallthrough
CT: control target
= control target key end

     0   :  { %15 = vsyncpa [#allocation6], 0  ;;  %s701_s0 = inlined_call_operand.hbm [shape: f32[16,32], index: 0, kind: input, shape index: {}]   ;;  %s702_s1 = inlined_call_operand.hbm [shape: f32[32,32], index: 1, kind: input, shape index: {}]   ;;  %s703_s2 = inlined_call_operand.hbm [shape: f32[32,32], index: 2, kind: input, shape index: {}]   ;;  %s704_s3 = inlined_call_operand.hbm [shape: f32[32,32], index: 3, kind: input, shape index: {}]   ;;  %s705_s4 = inlined_call_operand.vmem [shape: f32[1,32], index: 4, kind: input, shape index: {}]   ;;  %s706_s5 = inlined_call_operand.vmem [shape: f32[1,32], index: 5, kind: input, shape index: {}]   ;;  %s707_s6 = inlined_call_operand.vmem [shape: f32[1,32], index: 6, kind: input, shape index: {}]   ;;  %s708_s7 = inlined_call_operand.vmem [shape: f32[16,32], index: 7, kind: output, shape index: {0}]   ;;  %s709_s8 = inlined_call_operand.vmem [shape: f32[16,32], index: 8, kind: output, shape index: {1}]   ;;  %s710_s9 = inlined_call_operand.vmem [shape: f32[16,32], index: 9, kind: output, shape index: {2}]  }
   0x1   :  { %16 = vsyncpa [#allocation8], 0 }
   0x2   :  { %17 = vsyncpa [#allocation11], 0  ;;  %s569_s30 = smov [#allocation7]   ;;  %s570_s11 = smov [#allocation5]  }
   0x3   :  { %s35_s10 = sshll.u32 %s569_s30, 4  ;;  %s23_s12 = sshll.u32 %s570_s11, 4  ;;  %s36_s10 = int_to_ptr.vmem [resolvable:$true] %s35_s10  ;;  %s24_s12 = int_to_ptr.vmem [resolvable:$true] %s23_s12 }
   0x4   :  { %s491_s13 = scalar_lea.vmem %s36_s10, 512  ;;  %p496_p1 = scmp.lt.s32.totalorder %s36_s10, %s36_s10 }
   0x5   :  { %p492_p0 = scmp.ne.s32.totalorder %s36_s10, %s491_s13  ;;  %p497_p2 = scmp.lt.s32.totalorder %s491_s13, %s491_s13 }
   0x7   :  { %p498_p3 = por %p497_p2, %p496_p1 }
   0x9   :  { %p499_p4 = pnand %p498_p3, %p492_p0 }
   0xb   :  { %502 = shalt.err (!%p499_p4)
}
   0xc   :  { %s571_s14 = smov 128   ;;  %s572_s15 = smov 8  }
   0xd   :  { %41 = dma.hbm_to_vmem [thread:$0]  %s702_s1, 512, %s36_s10, [#allocation8], %s571_s14, %s571_s14, %s572_s15  }
   0xe   :  { %s511_s18 = scalar_lea.vmem %s24_s12, 256  ;;  %p516_p6 = scmp.lt.s32.totalorder %s24_s12, %s24_s12 }
   0xf   :  { %p512_p5 = scmp.ne.s32.totalorder %s24_s12, %s511_s18  ;;  %p517_p7 = scmp.lt.s32.totalorder %s511_s18, %s511_s18 }
  0x11   :  { %p518_p8 = por %p517_p7, %p516_p6 }
  0x13   :  { %p519_p9 = pnand %p518_p8, %p512_p5 }
  0x15   :  { %522 = shalt.err (!%p519_p9)
}
  0x16   :  { %29 = dma.hbm_to_vmem [thread:$0]  %s701_s0, 256, %s24_s12, [#allocation6], %s571_s14, %s571_s14, %s572_s15  }
  0x17   :  { %s573_s21 = smov [#allocation9]   ;;  %s574_s23 = smov [#allocation10]  }
  0x18   :  { %s47_s22 = sshll.u32 %s573_s21, 4  ;;  %s59_s24 = sshll.u32 %s574_s23, 4  ;;  %s48_s22 = int_to_ptr.vmem [resolvable:$true] %s47_s22  ;;  %s60_s24 = int_to_ptr.vmem [resolvable:$true] %s59_s24 }
  0x19   :  { %s531_s1 = scalar_lea.vmem %s48_s22, 512  ;;  %p536_p11 = scmp.lt.s32.totalorder %s48_s22, %s48_s22 }
  0x1a   :  { %p532_p10 = scmp.ne.s32.totalorder %s48_s22, %s531_s1  ;;  %p537_p12 = scmp.lt.s32.totalorder %s531_s1, %s531_s1 }
  0x1c   :  { %p538_p13 = por %p537_p12, %p536_p11 }
  0x1e   :  { %p539_p0 = pnand %p538_p13, %p532_p10 }
  0x20   :  { %542 = shalt.err (!%p539_p0)
}
  0x21   :  { %53 = dma.hbm_to_vmem [thread:$0]  %s703_s2, 512, %s48_s22, [#allocation8], %s571_s14, %s571_s14, %s572_s15  }
  0x22   :  { %s551_s0 = scalar_lea.vmem %s60_s24, 512  ;;  %p556_p2 = scmp.lt.s32.totalorder %s60_s24, %s60_s24 }
  0x23   :  { %p552_p1 = scmp.ne.s32.totalorder %s60_s24, %s551_s0  ;;  %p557_p3 = scmp.lt.s32.totalorder %s551_s0, %s551_s0 }
  0x25   :  { %p558_p4 = por %p557_p3, %p556_p2 }
  0x27   :  { %p559_p5 = pnand %p558_p4, %p552_p1 }
  0x29   :  { %562 = shalt.err (!%p559_p5)
}
  0x2a   :  { %65 = dma.hbm_to_vmem [thread:$0]  %s704_s3, 512, %s60_s24, [#allocation11], %s571_s14, %s571_s14, %s572_s15  }
  0x2b   :  { %563 = dma.done.wait [#allocation6], 256  }
  0x2c   :  { %564 = vsyncadd [#allocation6], 4294967040 }
  0x2d   :  { %565 = dma.done.wait [#allocation8], 1024  }
  0x2e   :  { %566 = vsyncadd [#allocation8], 4294966272 }
  0x2f   :  { %567 = dma.done.wait [#allocation11], 512  }
  0x30   :  { %568 = vsyncadd [#allocation11], 4294966784  ;;  %vm88_vm0 = vcmask 261120   ;;  %v575_v0 = vmov 0.0   ;;  %v102_v1 = vld [vmem:[#allocation7 + $0x18] sm:$0xff]  ;;  %v101_v2 = vld [vmem:[#allocation7 + $0x10] sm:$0xff] }
  0x31   :  { %90 = vst.msk [vmem:[#allocation2 + $0x8] sm:$0xff] %vm88_vm0, %v575_v0  ;;  %89 = vst.msk [vmem:[#allocation2] sm:$0xff] %vm88_vm0, %v575_v0  ;;  %443 = vmatprep.subr.mxu0 %v102_v1  ;;  %v194_v3 = vld [vmem:[#allocation9 + $0x18] sm:$0xff]  ;;  %v95_v4 = vld [vmem:[#allocation5] sm:$0xff] }
  0x32   :  { %91 = vst.msk [vmem:[#allocation3] sm:$0xff] %vm88_vm0, %v575_v0  ;;  %92 = vst.msk [vmem:[#allocation3 + $0x8] sm:$0xff] %vm88_vm0, %v575_v0  ;;  %444 = vmatpush3.msra.mxu0 %v102_v1  ;;  %v100_v5 = vld [vmem:[#allocation7 + $0x8] sm:$0xff]  ;;  %454 = vmatprep.subr.mxu1 %v194_v3  ;;  %v193_v6 = vld [vmem:[#allocation9 + $0x10] sm:$0xff] }
  0x33   :  { %93 = vst.msk [vmem:[#allocation4] sm:$0xff] %vm88_vm0, %v575_v0  ;;  %94 = vst.msk [vmem:[#allocation4 + $0x8] sm:$0xff] %vm88_vm0, %v575_v0  ;;  %445 = vmatprep.subr.mxu0 %v101_v2  ;;  %451 = vmatprep.mubr.msk.f32.mxu0 %vm88_vm0, %v95_v4  ;;  %v99_v7 = vld [vmem:[#allocation7] sm:$0xff]  ;;  %v192_v8 = vld [vmem:[#allocation9 + $0x8] sm:$0xff] }
  0x34   :  { %446 = vmatpush3.msra.mxu0 %v101_v2  ;;  %455 = vmatpush3.msra.mxu1 %v194_v3  ;;  %v96_v9 = vld [vmem:[#allocation5 + $0x8] sm:$0xff]  ;;  %v191_v11 = vld [vmem:[#allocation9] sm:$0xff]  ;;  %v278_v12 = vld [vmem:[#allocation10 + $0x10] sm:$0xff] }
  0x35   :  { %447 = vmatprep.subr.mxu0 %v100_v5  ;;  %456 = vmatprep.subr.mxu1 %v193_v6  ;;  %v279_v10 = vld [vmem:[#allocation10 + $0x18] sm:$0xff]  ;;  %v277_v13 = vld [vmem:[#allocation10 + $0x8] sm:$0xff]  ;;  %v276_v14 = vld [vmem:[#allocation10] sm:$0xff] }
  0x36   :  { %448 = vmatpush3.msra.mxu0 %v100_v5  ;;  %457 = vmatpush3.msra.mxu1 %v193_v6  ;;  %v422_v28 = vld [vmem:[%s705_s4] ss:$0 sm:$0xff] }
  0x37   :  { %449 = vmatprep.subr.mxu0 %v99_v7  ;;  %458 = vmatprep.subr.mxu1 %v192_v8  ;;  %v423_v37 = vld [vmem:[%s706_s5] ss:$0 sm:$0xff] }
  0x38   :  { %450 = vmatpush3.msra.mxu0 %v99_v7  ;;  %459 = vmatpush3.msra.mxu1 %v192_v8  ;;  %v98_v15 = vld [vmem:[#allocation2 + $0x8] sm:$0xff]  ;;  %v97_v17 = vld [vmem:[#allocation2] sm:$0xff] }
  0x39   :  { %452 = vmatmul.mubr.msk.f32.vlgmr.msra.gmra.mxu0 %vm88_vm0, %v96_v9  ;;  %465 = vmatprep.subr.mxu0 %v279_v10  ;;  %v190_v20 = vld [vmem:[#allocation3 + $0x8] sm:$0xff]  ;;  %v189_v23 = vld [vmem:[#allocation3] sm:$0xff]  ;;  %v424_v42 = vld [vmem:[%s707_s6] ss:$0 sm:$0xff] }
  0x3a   :  { %466 = vmatpush3.msra.mxu0 %v279_v10  ;;  %460 = vmatprep.subr.mxu1 %v191_v11  ;;  %v275_v26 = vld [vmem:[#allocation4 + $0x8] sm:$0xff]  ;;  %v274_v30 = vld [vmem:[#allocation4] sm:$0xff] }
  0x3b   :  { %467 = vmatprep.subr.mxu0 %v278_v12  ;;  %461 = vmatpush3.msra.mxu1 %v191_v11 }
  0x3c   :  { %468 = vmatpush3.msra.mxu0 %v278_v12  ;;  %462 = vmatprep.mubr.msk.f32.mxu1 %vm88_vm0, %v95_v4 }
  0x3d   :  { %469 = vmatprep.subr.mxu0 %v277_v13  ;;  %463 = vmatmul.mubr.msk.f32.vlgmr.msra.gmra.mxu1 %vm88_vm0, %v96_v9 }
  0x3e   :  { %470 = vmatpush3.msra.mxu0 %v277_v13  ;;  %473 = vmatprep.mubr.msk.f32.mxu0 %vm88_vm0, %v95_v4 }
  0x3f   :  { %471 = vmatprep.subr.mxu0 %v276_v14 }
  0x40   :  { %472 = vmatpush3.msra.mxu0 %v276_v14 }
  0x41   :  { %474 = vmatmul.mubr.msk.f32.vlgmr.msra.gmra.mxu0 %vm88_vm0, %v96_v9 }
  0xf9   :  { %v453_v16 = vpop.f32.mrf.mxu0 }
  0xfa   :  { %v186_v18 = vadd.f32 %v453_v16, %v98_v15 }
  0xfb   :  { %v176_v19 = vpop.f32.mrf.mxu0 }
  0xfc   :  { %188 = vst.msk [vmem:[#allocation2 + $0x8] sm:$0xff] %vm88_vm0, %v186_v18  ;;  %v185_v21 = vadd.f32 %v176_v19, %v97_v17 }
  0xfd   :  { %v464_v22 = vpop.f32.mrf.mxu1 }
  0xfe   :  { %187 = vst.msk [vmem:[#allocation2] sm:$0xff] %vm88_vm0, %v185_v21  ;;  %v271_v24 = vadd.f32 %v464_v22, %v190_v20 }
  0xff   :  { %v261_v25 = vpop.f32.mrf.mxu1 }
 0x100   :  { %273 = vst.msk [vmem:[#allocation3 + $0x8] sm:$0xff] %vm88_vm0, %v271_v24  ;;  %v270_v27 = vadd.f32 %v261_v25, %v189_v23 }
 0x101   :  { %v475_v29 = vpop.f32.mrf.mxu0 }
 0x102   :  { %272 = vst.msk [vmem:[#allocation3] sm:$0xff] %vm88_vm0, %v270_v27  ;;  %v356_v31 = vadd.f32 %v475_v29, %v275_v26 }
 0x103   :  { %v363_v32 = vld [vmem:[#allocation2 + $0x8] sm:$0xff]  ;;  %v346_v33 = vpop.f32.mrf.mxu0 }
 0x104   :  { %v372_v34 = vadd.f32 %v422_v28, %v363_v32  ;;  %358 = vst.msk [vmem:[#allocation4 + $0x8] sm:$0xff] %vm88_vm0, %v356_v31  ;;  %v355_v35 = vadd.f32 %v346_v33, %v274_v30 }
 0x105   :  { %v362_v36 = vld [vmem:[#allocation2] sm:$0xff] }
 0x106   :  { %374 = vst.msk [vmem:[%s708_s7 + $0x8] sm:$0xff] %vm88_vm0, %v372_v34  ;;  %v371_v38 = vadd.f32 %v422_v28, %v362_v36  ;;  %357 = vst.msk [vmem:[#allocation4] sm:$0xff] %vm88_vm0, %v355_v35 }
 0x107   :  { %v376_v39 = vld [vmem:[#allocation3 + $0x8] sm:$0xff] }
 0x108   :  { %373 = vst.msk [vmem:[%s708_s7] sm:$0xff] %vm88_vm0, %v371_v38  ;;  %v385_v40 = vadd.f32 %v423_v37, %v376_v39 }
 0x109   :  { %v375_v41 = vld [vmem:[#allocation3] sm:$0xff] }
 0x10a   :  { %387 = vst.msk [vmem:[%s709_s8 + $0x8] sm:$0xff] %vm88_vm0, %v385_v40  ;;  %v384_v43 = vadd.f32 %v423_v37, %v375_v41 }
 0x10b   :  { %v389_v44 = vld [vmem:[#allocation4 + $0x8] sm:$0xff] }
 0x10c   :  { %386 = vst.msk [vmem:[%s709_s8] sm:$0xff] %vm88_vm0, %v384_v43  ;;  %v398_v45 = vadd.f32 %v424_v42, %v389_v44 }
 0x10d   :  { %v388_v46 = vld [vmem:[#allocation4] sm:$0xff] }
 0x10e   :  { %400 = vst.msk [vmem:[%s710_s9 + $0x8] sm:$0xff] %vm88_vm0, %v398_v45  ;;  %v397_v47 = vadd.f32 %v424_v42, %v388_v46 }
 0x110   :  { %399 = vst.msk [vmem:[%s710_s9] sm:$0xff] %vm88_vm0, %v397_v47 }
 0x111   :  { %413 = vsyncpa [#allocation6], 1 }
 0x112   :  { %414 = vsyncpa [#allocation8], 1 }
 0x113   :  { %415 = vsyncpa [#allocation11], 1 }

// kernel: multihead_attention_forward.4
= control target key start
LH: loop header
LB: loop body
LE: loop exit
PB: predicated region body
PF: predicated region fallthrough
CT: control target
= control target key end

     0   :  { %10 = vsyncpa [#allocation7], 0  ;;  %s3367_s0 = inlined_call_operand.vmem [shape: f32[8,2,1,32], index: 0, kind: input, shape index: {}]   ;;  %s3368_s1 = inlined_call_operand.vmem [shape: f32[8,2,1,32], index: 1, kind: input, shape index: {}]   ;;  %s3369_s2 = inlined_call_operand.vmem [shape: f32[8,2,1,32], index: 2, kind: input, shape index: {}]   ;;  %s3370_s3 = inlined_call_operand.vmem [shape: f32[8,2,1,32], index: 3, kind: output, shape index: {0}]   ;;  %s3371_s4 = inlined_call_operand.hbm [shape: f32[2,8,8], index: 4, kind: output, shape index: {1}]  }
   0x1   :  { %12 = vsyncpa [#allocation7 + $0x1], 0  ;;  %s2841_s15 = smov 0   ;;  %s2843_s16 = smov 0  }
   0x2   :  { %s2845_s17 = smov 0   ;;  %s2847_s18 = smov 0  }
   0x3   :  { %s2849_s19 = smov 0   ;;  %s2851_s20 = smov 0  }
   0x4 LB: > { %s2562_s21 = sadd.s32 4294967295, %s2804_s20   ;;  %s2563_s22 = sadd.s32 4294967294, %s2804_s20   ;;  %s2804_s20 = sphi %s2851_s20, %s18_s20   ;;  %s2800_s19 = sphi %s2849_s19, %s3381_s19   ;;  %s2796_s18 = sphi %s2847_s18, %s3380_s18   ;;  %s2792_s17 = sphi %s2845_s17, %s3379_s17   ;;  %s2788_s16 = sphi %s2843_s16, %s3378_s16   ;;  %s2784_s15 = sphi %s2841_s15, %s3377_s15  }
   0x5   : > { %s30_s23 = sadd.s32 1, %s2800_s19  ;;  %s39_s24 = sadd.s32 1, %s2792_s17 }
   0x6   : > { %p32_p0 = scmp.ge.s32.totalorder %s30_s23, 2  ;;  %p46_p1 = scmp.ne.s32.totalorder %s2792_s17, %s2788_s16 }
   0x7   : > { %p47_p2 = scmp.eq.s32.totalorder %s2804_s20, 0  ;;  %p130_p3 = scmp.eq.s32.totalorder %s2562_s21, 1 }
   0x8   : > { %s3383_s23 = smov (%p32_p0, %s30_s23), 0  ;;  %p163_p6 = scmp.ne.s32.totalorder %s2788_s16, %s2784_s15 }
   0x9   : > { %p2880_p4 = por %p47_p2, %p46_p1  ;;  %p2884_p5 = por %p130_p3, %p46_p1 }
   0xa   : > { %s35_s27 = ssub.s32 %s2800_s19, %s3383_s23  ;;  %p164_p8 = scmp.eq.s32.totalorder %s2563_s22, 1 }
   0xb   : > { %p37_p7 = scmp.eq.s32.totalorder %s35_s27, 0  ;;  %p3372_p10 = scmp.ge.s32.totalorder %s2804_s20, 2 }
   0xc   : > { %p2895_p9 = por %p164_p8, %p163_p6 }
   0xd   : > { %s2893_s28 = scalar_select %p37_p7, %s2792_s17, %s39_s24  }
   0xe   : > { %180 = sbr.rel (%p3372_p10) target bundleno = 43 (0x2b), region = 16 }
  0x13   : > { %183 = sbr.rel (!%p2880_p4) target bundleno = 27 (0x1b), region = 20  ;;  %s185_s30 = sand.u32 (%p2880_p4), 1, %s2792_s17  }
  0x14   : > { %s191_s7 = scalar_lea.vmem (%p2880_p4), %s3367_s0, %s2800_s19  ;;  %s2566_s8 = sshll.u32 (%p2880_p4), %s185_s30, 3 }
  0x15   : > { %v208_v0 = vld [vmem:[%s191_s7] sm:$0x1] (%p2880_p4)  ;;  %v210_v1 = vld [vmem:[%s191_s7 + $0x2] sm:$0x1] (%p2880_p4)  ;;  %v212_v2 = vld [vmem:[%s191_s7 + $0x4] sm:$0x1] (%p2880_p4) }
  0x16   : > { %v214_v3 = vld [vmem:[%s191_s7 + $0x6] sm:$0x1] (%p2880_p4)  ;;  %s187_s9 = scalar_lea.vmem (%p2880_p4), [#allocation2], %s2566_s8  ;;  %v216_v4 = vld [vmem:[%s191_s7 + $0x8] sm:$0x1] (%p2880_p4) }
  0x17   : > { %209 = vst [vmem:[%s187_s9] sm:$0x1] (%p2880_p4), %v208_v0  ;;  %211 = vst [vmem:[%s187_s9 + $0x1] sm:$0x1] (%p2880_p4), %v210_v1  ;;  %v218_v5 = vld [vmem:[%s191_s7 + $0xa] sm:$0x1] (%p2880_p4) }
  0x18   : > { %213 = vst [vmem:[%s187_s9 + $0x2] sm:$0x1] %v212_v2  ;;  %215 = vst [vmem:[%s187_s9 + $0x3] sm:$0x1] %v214_v3  ;;  %v220_v6 = vld [vmem:[%s191_s7 + $0xc] sm:$0x1] }
  0x19   : > { %217 = vst [vmem:[%s187_s9 + $0x4] sm:$0x1] %v216_v4  ;;  %219 = vst [vmem:[%s187_s9 + $0x5] sm:$0x1] %v218_v5  ;;  %v222_v7 = vld [vmem:[%s191_s7 + $0xe] sm:$0x1] }
  0x1a   : > { %221 = vst [vmem:[%s187_s9 + $0x6] sm:$0x1] %v220_v6  ;;  %223 = vst [vmem:[%s187_s9 + $0x7] sm:$0x1] %v222_v7 }
  0x1b PF: > { %263 = sbr.rel (!%p2880_p4) target bundleno = 35 (0x23), region = 61  ;;  %s265_s10 = sand.u32 (%p2880_p4), 1, %s2792_s17  }
  0x1c   : > { %s268_s13 = scalar_lea.vmem (%p2880_p4), %s3368_s1, %s2800_s19  ;;  %s2567_s14 = sshll.u32 (%p2880_p4), %s265_s10, 3 }
  0x1d   : > { %v285_v8 = vld [vmem:[%s268_s13] sm:$0x1] (%p2880_p4)  ;;  %v287_v9 = vld [vmem:[%s268_s13 + $0x2] sm:$0x1] (%p2880_p4)  ;;  %v289_v10 = vld [vmem:[%s268_s13 + $0x4] sm:$0x1] (%p2880_p4) }
  0x1e   : > { %v291_v11 = vld [vmem:[%s268_s13 + $0x6] sm:$0x1] (%p2880_p4)  ;;  %s267_s21 = scalar_lea.vmem (%p2880_p4), [#allocation3], %s2567_s14  ;;  %v293_v12 = vld [vmem:[%s268_s13 + $0x8] sm:$0x1] (%p2880_p4) }
  0x1f   : > { %286 = vst [vmem:[%s267_s21] sm:$0x1] (%p2880_p4), %v285_v8  ;;  %288 = vst [vmem:[%s267_s21 + $0x1] sm:$0x1] (%p2880_p4), %v287_v9  ;;  %v295_v13 = vld [vmem:[%s268_s13 + $0xa] sm:$0x1] (%p2880_p4) }
  0x20   : > { %290 = vst [vmem:[%s267_s21 + $0x2] sm:$0x1] %v289_v10  ;;  %292 = vst [vmem:[%s267_s21 + $0x3] sm:$0x1] %v291_v11  ;;  %v297_v14 = vld [vmem:[%s268_s13 + $0xc] sm:$0x1] }
  0x21   : > { %294 = vst [vmem:[%s267_s21 + $0x4] sm:$0x1] %v293_v12  ;;  %296 = vst [vmem:[%s267_s21 + $0x5] sm:$0x1] %v295_v13  ;;  %v299_v15 = vld [vmem:[%s268_s13 + $0xe] sm:$0x1] }
  0x22   : > { %298 = vst [vmem:[%s267_s21 + $0x6] sm:$0x1] %v297_v14  ;;  %300 = vst [vmem:[%s267_s21 + $0x7] sm:$0x1] %v299_v15 }
  0x23 PF: > { %340 = sbr.rel (!%p2880_p4) target bundleno = 43 (0x2b), region = 102  ;;  %s342_s22 = sand.u32 (%p2880_p4), 1, %s2792_s17  }
  0x24   : > { %s345_s30 = scalar_lea.vmem (%p2880_p4), %s3369_s2, %s2800_s19  ;;  %s2568_s5 = sshll.u32 (%p2880_p4), %s342_s22, 3 }
  0x25   : > { %v362_v16 = vld [vmem:[%s345_s30] sm:$0x1] (%p2880_p4)  ;;  %v364_v17 = vld [vmem:[%s345_s30 + $0x2] sm:$0x1] (%p2880_p4)  ;;  %v366_v18 = vld [vmem:[%s345_s30 + $0x4] sm:$0x1] (%p2880_p4) }
  0x26   : > { %v368_v19 = vld [vmem:[%s345_s30 + $0x6] sm:$0x1] (%p2880_p4)  ;;  %s344_s6 = scalar_lea.vmem (%p2880_p4), [#allocation4], %s2568_s5  ;;  %v370_v20 = vld [vmem:[%s345_s30 + $0x8] sm:$0x1] (%p2880_p4) }
  0x27   : > { %363 = vst [vmem:[%s344_s6] sm:$0x1] (%p2880_p4), %v362_v16  ;;  %365 = vst [vmem:[%s344_s6 + $0x1] sm:$0x1] (%p2880_p4), %v364_v17  ;;  %v372_v21 = vld [vmem:[%s345_s30 + $0xa] sm:$0x1] (%p2880_p4) }
  0x28   : > { %367 = vst [vmem:[%s344_s6 + $0x2] sm:$0x1] %v366_v18  ;;  %369 = vst [vmem:[%s344_s6 + $0x3] sm:$0x1] %v368_v19  ;;  %v374_v22 = vld [vmem:[%s345_s30 + $0xc] sm:$0x1] }
  0x29   : > { %371 = vst [vmem:[%s344_s6 + $0x4] sm:$0x1] %v370_v20  ;;  %373 = vst [vmem:[%s344_s6 + $0x5] sm:$0x1] %v372_v21  ;;  %v376_v23 = vld [vmem:[%s345_s30 + $0xe] sm:$0x1] }
  0x2a   : > { %375 = vst [vmem:[%s344_s6 + $0x6] sm:$0x1] %v374_v22  ;;  %377 = vst [vmem:[%s344_s6 + $0x7] sm:$0x1] %v376_v23 }
  0x2b PF: > { %p2569_p11 = scmp.ge.s32.totalorder %s2804_s20, 1  ;;  %p416_p12 = scmp.lt.s32.totalorder %s2804_s20, 3 }
  0x2d   : > { %p417_p13 = pnand %p2569_p11, %p416_p12 }
  0x2e   : > { %s423_s25 = sand.u32 (!%p417_p13), 1, %s2788_s16   ;;  %s2809_s10 = smov (!%p417_p13), 120  }
  0x2f   : > { %420 = sbr.rel (%p417_p13) target bundleno = 1498 (0x5da), region = 143  ;;  %s2929_s7 = sshll.u32 (!%p417_p13), %s423_s25, 3 }
  0x30   : > { %s2939_s8 = scalar_lea.vmem (!%p417_p13), [#allocation3], %s2929_s7  ;;  %s2953_s9 = scalar_lea.vmem (!%p417_p13), [#allocation2], %s2929_s7 }
  0x31   : > { %s2810_s11 = smov (!%p417_p13), 112   ;;  %s2811_s12 = smov (!%p417_p13), 104  }
  0x32   : > { %s3074_s13 = scalar_lea.vmem (!%p417_p13), [#allocation4], %s2929_s7  ;;  %s3118_s14 = scalar_lea.vmem (!%p417_p13), [#allocation5], %s2929_s7 }
  0x33   : > { %s473_s21 = scalar_lea.vmem (!%p417_p13), [#allocation6], %s2929_s7  ;;  %s2812_s22 = smov (!%p417_p13), 8  }
  0x34   : > { %v515_v24 = vlaneseq  ;;  %v2806_v25 = vmov 0.0   ;;  %v2807_v26 = vmov 1966171168   ;;  %vm2808_vm0 = vmmov 0   ;;  %v484_v29 = vld [vmem:[%s2939_s8] sm:$0x1] }
  0x35   : > { %2608 = vmatprep.subr.mxu0 %v2806_v25  ;;  %v513_v27 = vunpack.c.l.s4 %v2807_v26  ;;  %2613 = vmatprep.subr.mxu1 %v2806_v25  ;;  %v485_v30 = vld [vmem:[%s2939_s8 + $0x1] sm:$0x1]  ;;  %v486_v31 = vld [vmem:[%s2939_s8 + $0x2] sm:$0x1]  ;;  %v487_v33 = vld [vmem:[%s2939_s8 + $0x3] sm:$0x1] }
  0x36   : > { %v2932_v28 = vshrl.u32 %v515_v24, 7  ;;  %2610 = vmatprep.mubr.msk.f32.mxu0 %vm2808_vm0, %v2806_v25  ;;  %2615 = vmatprep.mubr.msk.f32.mxu1 %vm2808_vm0, %v2806_v25  ;;  %v488_v34 = vld [vmem:[%s2939_s8 + $0x4] sm:$0x1]  ;;  %v489_v35 = vld [vmem:[%s2939_s8 + $0x5] sm:$0x1]  ;;  %v565_v36 = vcombine.low %v484_v29, %v485_v30  ;;  %v566_v40 = vcombine.low %v486_v31, %v487_v33  ;;  %vm614_vm1 = vcmask 64512  }
  0x37   : > { %v514_v32 = vunpack.c.0.s8 %v513_v27  ;;  %v490_v37 = vld [vmem:[%s2939_s8 + $0x6] sm:$0x1]  ;;  %v491_v38 = vld [vmem:[%s2939_s8 + $0x7] sm:$0x1]  ;;  %v567_v41 = vcombine.low %v488_v34, %v489_v35  ;;  %v476_v42 = vld [vmem:[%s2953_s9] sm:$0x1] }
  0x38   : > { %v568_v43 = vcombine.low %v490_v37, %v491_v38  ;;  %v477_v44 = vld [vmem:[%s2953_s9 + $0x1] sm:$0x1]  ;;  %v478_v45 = vld [vmem:[%s2953_s9 + $0x2] sm:$0x1]  ;;  %v479_v46 = vld [vmem:[%s2953_s9 + $0x3] sm:$0x1] }
  0x39   : > { %v2950_v39 = vsub.s32 %v514_v32, %v2932_v28  ;;  %v480_v50 = vld [vmem:[%s2953_s9 + $0x4] sm:$0x1]  ;;  %v481_v51 = vld [vmem:[%s2953_s9 + $0x5] sm:$0x1]  ;;  %v482_v52 = vld [vmem:[%s2953_s9 + $0x6] sm:$0x1]  ;;  %v508_v53 = vcombine.low %v476_v42, %v477_v44  ;;  %v509_v56 = vcombine.low %v478_v45, %v479_v46 }
  0x3a   : > { %v483_v55 = vld [vmem:[%s2953_s9 + $0x7] sm:$0x1]  ;;  %v510_v57 = vcombine.low %v480_v50, %v481_v51  ;;  %v907_v12 = vld [vmem:[%s2939_s8] sm:$0x1]  ;;  %v908_v13 = vld [vmem:[%s2939_s8 + $0x1] sm:$0x1] }
  0x3b   : > { %v575_v47 = vrot.slane %v565_v36, %v2950_v39  ;;  %v582_v48 = vrot.slane %v566_v40, %v2950_v39  ;;  %v589_v49 = vrot.slane %v567_v41, %v2950_v39  ;;  %v596_v54 = vrot.slane %v568_v43, %v2950_v39  ;;  %v909_v14 = vld [vmem:[%s2939_s8 + $0x2] sm:$0x1]  ;;  %v910_v15 = vld [vmem:[%s2939_s8 + $0x3] sm:$0x1]  ;;  %v911_v16 = vld [vmem:[%s2939_s8 + $0x4] sm:$0x1] }
  0x3c   : > { %v511_v59 = vcombine.low %v482_v52, %v483_v55  ;;  %v518_v60 = vrot.slane %v508_v53, %v2950_v39  ;;  %v525_v62 = vrot.slane %v509_v56, %v2950_v39  ;;  %v532_v63 = vrot.slane %v510_v57, %v2950_v39  ;;  %v912_v17 = vld [vmem:[%s2939_s8 + $0x5] sm:$0x1]  ;;  %v913_v19 = vld [vmem:[%s2939_s8 + $0x6] sm:$0x1]  ;;  %v914_v20 = vld [vmem:[%s2939_s8 + $0x7] sm:$0x1] }
  0x3d   : > { %v597_v58 = vcombine.low %v575_v47, %v582_v48  ;;  %v598_v61 = vcombine.low %v589_v49, %v596_v54  ;;  %v990_v18 = vcombine.low %v907_v12, %v908_v13  ;;  %v991_v21 = vcombine.low %v909_v14, %v910_v15  ;;  %v899_v26 = vld [vmem:[%s2953_s9] sm:$0x1]  ;;  %v900_v27 = vld [vmem:[%s2953_s9 + $0x1] sm:$0x1]  ;;  %v901_v29 = vld [vmem:[%s2953_s9 + $0x2] sm:$0x1] }
  0x3e   : > { %v539_v1 = vrot.slane %v511_v59, %v2950_v39  ;;  %v540_v3 = vcombine.low %v518_v60, %v525_v62  ;;  %v992_v22 = vcombine.low %v911_v16, %v912_v17  ;;  %v993_v23 = vcombine.low %v913_v19, %v914_v20  ;;  %v902_v32 = vld [vmem:[%s2953_s9 + $0x3] sm:$0x1]  ;;  %v903_v33 = vld [vmem:[%s2953_s9 + $0x4] sm:$0x1]  ;;  %v904_v34 = vld [vmem:[%s2953_s9 + $0x5] sm:$0x1] }
  0x3f   : > { %v605_v0 = vrot.slane %v597_v58, %v2950_v39  ;;  %v612_v2 = vrot.slane %v598_v61, %v2950_v39  ;;  %v1000_v24 = vrot.slane %v990_v18, %v2950_v39  ;;  %v1007_v30 = vrot.slane %v991_v21, %v2950_v39  ;;  %v905_v37 = vld [vmem:[%s2953_s9 + $0x6] sm:$0x1]  ;;  %v906_v38 = vld [vmem:[%s2953_s9 + $0x7] sm:$0x1]  ;;  %v1375_v42 = vld [vmem:[%s2953_s9] sm:$0x1] }
  0x40   : > { %v541_v4 = vcombine.low %v532_v63, %v539_v1  ;;  %v548_v6 = vrot.slane %v540_v3, %v2950_v39  ;;  %v1014_v31 = vrot.slane %v992_v22, %v2950_v39  ;;  %v931_v35 = vcombine.low %v899_v26, %v900_v27  ;;  %v1376_v46 = vld [vmem:[%s2953_s9 + $0x1] sm:$0x1]  ;;  %v1377_v47 = vld [vmem:[%s2953_s9 + $0x2] sm:$0x1]  ;;  %v1378_v48 = vld [vmem:[%s2953_s9 + $0x3] sm:$0x1] }
  0x41   : > { %v613_v5 = vcombine.low %v605_v0, %v612_v2  ;;  %v1021_v36 = vrot.slane %v993_v23, %v2950_v39  ;;  %v932_v40 = vcombine.low %v901_v29, %v902_v32  ;;  %v933_v41 = vcombine.low %v903_v33, %v904_v34  ;;  %v1379_v52 = vld [vmem:[%s2953_s9 + $0x4] sm:$0x1]  ;;  %v1380_v53 = vld [vmem:[%s2953_s9 + $0x5] sm:$0x1]  ;;  %v1381_v54 = vld [vmem:[%s2953_s9 + $0x6] sm:$0x1] }
  0x42   : > { %v555_v7 = vrot.slane %v541_v4, %v2950_v39  ;;  %v1022_v43 = vcombine.low %v1000_v24, %v1007_v30  ;;  %v934_v44 = vcombine.low %v905_v37, %v906_v38  ;;  %v941_v45 = vrot.slane %v931_v35, %v2950_v39  ;;  %v1382_v58 = vld [vmem:[%s2953_s9 + $0x7] sm:$0x1]  ;;  %v1859_v15 = vld [vmem:[%s2939_s8] sm:$0x1]  ;;  %v1860_v16 = vld [vmem:[%s2939_s8 + $0x1] sm:$0x1] }
  0x43   : > { %2609 = vmatpush3.xpose.msk.msra.mxu0 %vm614_vm1, %v613_v5  ;;  %v1023_v49 = vcombine.low %v1014_v31, %v1021_v36  ;;  %v948_v50 = vrot.slane %v932_v40, %v2950_v39  ;;  %v955_v51 = vrot.slane %v933_v41, %v2950_v39  ;;  %v1407_v55 = vcombine.low %v1375_v42, %v1376_v46  ;;  %v1861_v17 = vld [vmem:[%s2939_s8 + $0x2] sm:$0x1]  ;;  %v1862_v18 = vld [vmem:[%s2939_s8 + $0x3] sm:$0x1]  ;;  %v1863_v19 = vld [vmem:[%s2939_s8 + $0x4] sm:$0x1] }
  0x44   : > { %v556_v8 = vcombine.low %v548_v6, %v555_v7  ;;  %2623 = vmatprep.subr.mxu0 %v2806_v25  ;;  %v1030_v56 = vrot.slane %v1022_v43, %v2950_v39  ;;  %v962_v57 = vrot.slane %v934_v44, %v2950_v39  ;;  %v1408_v59 = vcombine.low %v1377_v47, %v1378_v48  ;;  %v1864_v20 = vld [vmem:[%s2939_s8 + $0x5] sm:$0x1]  ;;  %v1865_v22 = vld [vmem:[%s2939_s8 + $0x6] sm:$0x1]  ;;  %v1866_v23 = vld [vmem:[%s2939_s8 + $0x7] sm:$0x1] }
  0x45   : > { %v1409_v60 = vcombine.low %v1379_v52, %v1380_v53  ;;  %v1037_v61 = vrot.slane %v1023_v49, %v2950_v39  ;;  %v963_v62 = vcombine.low %v941_v45, %v948_v50  ;;  %v1410_v63 = vcombine.low %v1381_v54, %v1382_v58  ;;  %v1851_v30 = vld [vmem:[%s2953_s9] sm:$0x1]  ;;  %v1852_v31 = vld [vmem:[%s2953_s9 + $0x1] sm:$0x1]  ;;  %v1853_v32 = vld [vmem:[%s2953_s9 + $0x2] sm:$0x1] }
  0x46   : > { %2611 = vmatmul.mubr.msk.f32.vlgmr.msra.gmra.mxu0 %vm614_vm1, %v556_v8  ;;  %v1417_v0 = vrot.slane %v1407_v55, %v2950_v39  ;;  %v964_v1 = vcombine.low %v955_v51, %v962_v57  ;;  %v1424_v2 = vrot.slane %v1408_v59, %v2950_v39  ;;  %v1942_v21 = vcombine.low %v1859_v15, %v1860_v16  ;;  %v1854_v35 = vld [vmem:[%s2953_s9 + $0x3] sm:$0x1]  ;;  %v1855_v36 = vld [vmem:[%s2953_s9 + $0x4] sm:$0x1]  ;;  %v1856_v37 = vld [vmem:[%s2953_s9 + $0x5] sm:$0x1] }
  0x47   : > { %2625 = vmatprep.mubr.msk.f32.mxu0 %vm2808_vm0, %v2806_v25  ;;  %v1431_v3 = vrot.slane %v1409_v60, %v2950_v39  ;;  %v1038_v4 = vcombine.low %v1030_v56, %v1037_v61  ;;  %v971_v5 = vrot.slane %v963_v62, %v2950_v39  ;;  %v1438_v6 = vrot.slane %v1410_v63, %v2950_v39  ;;  %v1857_v41 = vld [vmem:[%s2953_s9 + $0x6] sm:$0x1]  ;;  %v1858_v42 = vld [vmem:[%s2953_s9 + $0x7] sm:$0x1]  ;;  %v1383_v63 = vld [vmem:[%s2939_s8] sm:$0x1] }
  0x48   : > { %v978_v7 = vrot.slane %v964_v1, %v2950_v39  ;;  %v1439_v8 = vcombine.low %v1417_v0, %v1424_v2  ;;  %v1943_v24 = vcombine.low %v1861_v17, %v1862_v18  ;;  %v1944_v26 = vcombine.low %v1863_v19, %v1864_v20  ;;  %v1384_v0 = vld [vmem:[%s2939_s8 + $0x1] sm:$0x1]  ;;  %v1385_v1 = vld [vmem:[%s2939_s8 + $0x2] sm:$0x1]  ;;  %v492_v19 = vld [vmem:[%s3074_s13] sm:$0x1] }
  0x49   : > { %1039 = vrot.lane.b32.xlu1 %v1038_v4, %s2809_s10  ;;  %v1945_v27 = vcombine.low %v1865_v22, %v1866_v23  ;;  %v1952_v29 = vrot.slane %v1942_v21, %v2950_v39  ;;  %v1883_v38 = vcombine.low %v1851_v30, %v1852_v31  ;;  %v1884_v43 = vcombine.low %v1853_v32, %v1854_v35  ;;  %v1387_v4 = vld [vmem:[%s2939_s8 + $0x4] sm:$0x1]  ;;  %v493_v20 = vld [vmem:[%s3074_s13 + $0x1] sm:$0x1]  ;;  %v494_v21 = vld [vmem:[%s3074_s13 + $0x2] sm:$0x1] }
  0x4a   : > { %v1447_v12 = vrot.slane %v1439_v8, %v2950_v39  ;;  %v1959_v33 = vrot.slane %v1943_v24, %v2950_v39  ;;  %v1966_v34 = vrot.slane %v1944_v26, %v2950_v39  ;;  %v1885_v44 = vcombine.low %v1855_v36, %v1856_v37  ;;  %v1390_v8 = vld [vmem:[%s2939_s8 + $0x7] sm:$0x1]  ;;  %v495_v22 = vld [vmem:[%s3074_s13 + $0x3] sm:$0x1]  ;;  %v496_v23 = vld [vmem:[%s3074_s13 + $0x4] sm:$0x1] }
  0x4b   : > { %v1973_v40 = vrot.slane %v1945_v27, %v2950_v39  ;;  %v1886_v46 = vcombine.low %v1857_v41, %v1858_v42  ;;  %v1893_v47 = vrot.slane %v1883_v38, %v2950_v39  ;;  %v1900_v49 = vrot.slane %v1884_v43, %v2950_v39  ;;  %v497_v24 = vld [vmem:[%s3074_s13 + $0x5] sm:$0x1]  ;;  %v498_v27 = vld [vmem:[%s3074_s13 + $0x6] sm:$0x1]  ;;  %s2813_s24 = smov 16   ;;  %s2814_s27 = smov 24  }
  0x4c   : > { %v1974_v45 = vcombine.low %v1952_v29, %v1959_v33  ;;  %v1907_v50 = vrot.slane %v1885_v44, %v2950_v39  ;;  %v709_v26 = vcombine.low %v492_v19, %v493_v20  ;;  %v499_v29 = vld [vmem:[%s3074_s13 + $0x7] sm:$0x1]  ;;  %v710_v30 = vcombine.low %v494_v21, %v495_v22  ;;  %v1391_v21 = vld [vmem:[%s3074_s13] sm:$0x1]  ;;  %v1392_v22 = vld [vmem:[%s3074_s13 + $0x1] sm:$0x1] }
  0x4d   : > { %v1975_v48 = vcombine.low %v1966_v34, %v1973_v40  ;;  %v1914_v52 = vrot.slane %v1886_v46, %v2950_v39  ;;  %v1915_v54 = vcombine.low %v1893_v47, %v1900_v49  ;;  %v711_v31 = vcombine.low %v496_v23, %v497_v24  ;;  %v1393_v23 = vld [vmem:[%s3074_s13 + $0x2] sm:$0x1]  ;;  %v1394_v24 = vld [vmem:[%s3074_s13 + $0x3] sm:$0x1]  ;;  %s3309_s30 = scalar_lea.sflag [#allocation7], %s423_s25 }
  0x4e   : > { %v1982_v51 = vrot.slane %v1974_v45, %v2950_v39  ;;  %v712_v34 = vcombine.low %v498_v27, %v499_v29  ;;  %v719_v35 = vrot.slane %v709_v26, %v2950_v39  ;;  %v726_v36 = vrot.slane %v710_v30, %v2950_v39  ;;  %v1395_v26 = vld [vmem:[%s3074_s13 + $0x4] sm:$0x1]  ;;  %v1396_v27 = vld [vmem:[%s3074_s13 + $0x5] sm:$0x1]  ;;  %v1397_v29 = vld [vmem:[%s3074_s13 + $0x6] sm:$0x1] }
  0x4f   : > { %v1989_v53 = vrot.slane %v1975_v48, %v2950_v39  ;;  %v1916_v55 = vcombine.low %v1907_v50, %v1914_v52  ;;  %v1923_v57 = vrot.slane %v1915_v54, %v2950_v39  ;;  %v733_v37 = vrot.slane %v711_v31, %v2950_v39  ;;  %v1398_v30 = vld [vmem:[%s3074_s13 + $0x7] sm:$0x1] }
  0x50   : > { %v740_v38 = vrot.slane %v712_v34, %v2950_v39  ;;  %v741_v40 = vcombine.low %v719_v35, %v726_v36  ;;  %vm890_vm2 = vcmask 57344   ;;  %v1611_v31 = vcombine.low %v1391_v21, %v1392_v22 }
  0x51   : > { %v1990_v56 = vcombine.low %v1982_v51, %v1989_v53  ;;  %v1930_v58 = vrot.slane %v1916_v55, %v2950_v39  ;;  %v1614_v34 = vcombine.low %v1397_v29, %v1398_v30  ;;  %vm1366_vm3 = vcmask 122944  }
  0x52   : > { %v742_v42 = vcombine.low %v733_v37, %v740_v38  ;;  %v749_v43 = vrot.slane %v741_v40, %v2950_v39  ;;  %v1621_v37 = vrot.slane %v1611_v31, %v2950_v39  ;;  %vm1842_vm4 = vcmask 188544  }
  0x53   : > { %v1931_v59 = vcombine.low %v1923_v57, %v1930_v58  ;;  %vm2318_vm5 = vcmask 254144  }
  0x54   : > { %v756_v44 = vrot.slane %v742_v42, %v2950_v39  ;;  %v915_v42 = vld [vmem:[%s3074_s13] sm:$0x1] }
  0x56   : > { %v757_v45 = vcombine.low %v749_v43, %v756_v44  ;;  %v916_v43 = vld [vmem:[%s3074_s13 + $0x1] sm:$0x1]  ;;  %v917_v44 = vld [vmem:[%s3074_s13 + $0x2] sm:$0x1] }
  0x58   : > { %2614 = vmatpush3.msra.mxu1 %v757_v45 }
  0x59   : > { %2618 = vmatprep.subr.mxu1 %v2806_v25 }
  0xbb   : > { %v1040_v47 = vpop.permute.xlu1 %1039 }
 0x106   : > { %v2980_v9 = vpop.f32.mrf.mxu0 }
 0x107   : > { %v689_v10 = vsel %vm614_vm1, %v2980_v9, -inf }
 0x108   : > { %690 = vmax.xlane.f32.xlu0 %v689_v10  ;;  %v2612_v11 = vpop.f32.mrf.mxu0  ;;  %v1440_v10 = vcombine.low %v1431_v3, %v1438_v6  ;;  %v1386_v3 = vld [vmem:[%s2939_s8 + $0x3] sm:$0x1] }
 0x109   : > { %v979_v11 = vcombine.low %v971_v5, %v978_v7  ;;  %v1388_v5 = vld [vmem:[%s2939_s8 + $0x5] sm:$0x1]  ;;  %v1389_v7 = vld [vmem:[%s2939_s8 + $0x6] sm:$0x1]  ;;  %s2344_s8 = scalar_lea.vmem (%p2884_p5), %s3370_s3, %s2796_s18 }
 0x10a   : > { %v1454_v13 = vrot.slane %v1440_v10, %v2950_v39  ;;  %v1466_v10 = vcombine.low %v1383_v63, %v1384_v0 }
 0x10b   : > { %980 = vrot.lane.b32.xlu1 %v979_v11, %s2809_s10  ;;  %v1467_v11 = vcombine.low %v1385_v1, %v1386_v3 }
 0x10c   : > { %v1455_v14 = vcombine.low %v1447_v12, %v1454_v13  ;;  %v1468_v12 = vcombine.low %v1387_v4, %v1388_v5  ;;  %v1469_v13 = vcombine.low %v1389_v7, %v1390_v8 }
 0x10e   : > { %v1490_v15 = vrot.slane %v1468_v12, %v2950_v39  ;;  %v1497_v16 = vrot.slane %v1469_v13, %v2950_v39 }
 0x10f   : > { %1456 = vrot.lane.b32.xlu1 %v1455_v14, %s2810_s11  ;;  %v1483_v14 = vrot.slane %v1467_v11, %v2950_v39 }
 0x110   : > { %v1499_v18 = vcombine.low %v1490_v15, %v1497_v16 }
 0x112   : > { %v1513_v33 = vrot.slane %v1499_v18, %v2950_v39 }
 0x113   : > { %1991 = vrot.lane.b32.xlu1 %v1990_v56, %s2811_s12 }
 0x117   : > { %1932 = vrot.lane.b32.xlu1 %v1931_v59, %s2811_s12 }
 0x17d   : > { %v981_v48 = vpop.permute.xlu1 %980 }
 0x181   : > { %v1457_v50 = vpop.permute.xlu1 %1456 }
 0x185   : > { %v1992_v53 = vpop.permute.xlu1 %1991 }
 0x189   : > { %v1933_v54 = vpop.permute.xlu1 %1932 }
 0x191   : > { %v691_v60 = vpop.xlane.xlu0 %690 }
 0x192   : > { %v692_v61 = vsub.f32 %v2980_v9, %v691_v60  ;;  %v1476_v9 = vrot.slane %v1466_v10, %v2950_v39 }
 0x194   : > { %v693_v62 = vmul.f32 1.442695, %v692_v61  ;;  %v1498_v17 = vcombine.low %v1476_v9, %v1483_v14 }
 0x196   : > { %2712 = vpow2.f32 %v693_v62  ;;  %v1506_v32 = vrot.slane %v1498_v17, %v2950_v39 }
 0x198   : > { %v1514_v41 = vcombine.low %v1506_v32, %v1513_v33  ;;  %v1612_v32 = vcombine.low %v1393_v23, %v1394_v24  ;;  %v1613_v33 = vcombine.low %v1395_v26, %v1396_v27 }
 0x19a   : > { %v1628_v38 = vrot.slane %v1612_v32, %v2950_v39  ;;  %v1635_v40 = vrot.slane %v1613_v33, %v2950_v39 }
 0x1a3   : > { %v2713_v2 = vpop.eup %2712 }
 0x1a4   : > { %v695_v6 = vsel %vm614_vm1, %v2713_v2, 0.0 }
 0x1a5   : > { %696 = vadd.xlane.f32.xlu0 %v695_v6 }
 0x1bb   : > { %1515 = vrot.lane.b32.xlu0 %v1514_v41, %s2810_s11  ;;  %v1642_v41 = vrot.slane %v1614_v34, %v2950_v39 }
 0x22e   : > { %v697_v46 = vpop.xlane.xlu0 %696 }
 0x22f   : > { %2714 = vrcp.f32 %v697_v46  ;;  %v918_v46 = vld [vmem:[%s3074_s13 + $0x3] sm:$0x1] }
 0x232   : > { %v1516_v52 = vpop.permute.xlu0 %1515 }
 0x23c   : > { %v2715_v49 = vpop.eup %2714 }
 0x23d   : > { %v3094_v51 = vmul.f32 %v2715_v49, %v2713_v2 }
 0x23f   : > { %2616 = vmatmul.mubr.msk.f32.vlgmr.msra.gmra.mxu1 %vm614_vm1, %v3094_v51 }
 0x240   : > { %2619 = vmatpush3.xpose.msk.msra.mxu1 %vm614_vm1, %v1040_v47  ;;  %2620 = vmatprep.mubr.msk.f32.mxu1 %vm2808_vm0, %v2806_v25  ;;  %v919_v47 = vld [vmem:[%s3074_s13 + $0x4] sm:$0x1] }
 0x241   : > { %2628 = vmatprep.subr.mxu1 %v2806_v25 }
 0x243   : > { %2621 = vmatmul.mubr.msk.f32.vlgmr.msra.gmra.mxu1 %vm614_vm1, %v981_v48  ;;  %v920_v48 = vld [vmem:[%s3074_s13 + $0x5] sm:$0x1] }
 0x244   : > { %2629 = vmatpush3.xpose.msk.msra.mxu1 %vm614_vm1, %v1516_v52  ;;  %2630 = vmatprep.mubr.msk.f32.mxu1 %vm2808_vm0, %v2806_v25  ;;  %v922_v52 = vld [vmem:[%s3074_s13 + $0x7] sm:$0x1] }
 0x245   : > { %2638 = vmatprep.subr.mxu1 %v2806_v25 }
 0x247   : > { %2631 = vmatmul.mubr.msk.f32.vlgmr.msra.gmra.mxu1 %vm614_vm1, %v1457_v50  ;;  %v921_v50 = vld [vmem:[%s3074_s13 + $0x6] sm:$0x1] }
 0x248   : > { %2639 = vmatpush3.xpose.msk.msra.mxu1 %vm614_vm1, %v1992_v53  ;;  %2640 = vmatprep.mubr.msk.f32.mxu1 %vm2808_vm0, %v2806_v25  ;;  %v1643_v53 = vcombine.low %v1621_v37, %v1628_v38 }
 0x24b   : > { %2641 = vmatmul.mubr.msk.f32.vlgmr.msra.gmra.mxu1 %vm614_vm1, %v1933_v54  ;;  %v1644_v54 = vcombine.low %v1635_v40, %v1642_v41 }
 0x2ff   : > { %v828_v55 = vpop.f32.mrf.mxu1 }
 0x300   : > { %v833_v56 = vcombine.high %v828_v55, %v828_v55  ;;  %v840_v57 = vrot.slane %v828_v55, %v2950_v39  ;;  %v1135_v55 = vcombine.low %v915_v42, %v916_v43 }
 0x301   : > { %v2617_v58 = vpop.f32.mrf.mxu1 }
 0x302   : > { %v847_v59 = vrot.slane %v833_v56, %v2950_v39  ;;  %v848_v60 = vcombine.high %v840_v57, %v840_v57  ;;  %v856_v61 = vrot.slane %v840_v57, %v2950_v39  ;;  %v1136_v56 = vcombine.low %v917_v44, %v918_v46 }
 0x303   : > { %v1111_v62 = vpop.f32.mrf.mxu1  ;;  %v1137_v57 = vcombine.low %v919_v47, %v920_v48  ;;  %v1138_v58 = vcombine.low %v921_v50, %v922_v52 }
 0x304   : > { %v849_v63 = vcombine.high %v847_v59, %v847_v59  ;;  %v863_v0 = vrot.slane %v847_v59, %v2950_v39  ;;  %v870_v1 = vrot.slane %v848_v60, %v2950_v39  ;;  %v878_v2 = vcombine.high %v856_v61, %v856_v61  ;;  %891 = vst.msk [vmem:[%s3118_s14] sm:$0x1] %vm890_vm2, %v856_v61 }
 0x305   : > { %v1115_v3 = vsel %vm614_vm1, %v1111_v62, -inf  ;;  %v2622_v4 = vpop.f32.mrf.mxu1  ;;  %v1651_v59 = vrot.slane %v1643_v53, %v2950_v39  ;;  %v1658_v60 = vrot.slane %v1644_v54, %v2950_v39  ;;  %v1145_v61 = vrot.slane %v1135_v55, %v2950_v39 }
 0x306   : > { %v877_v5 = vrot.slane %v849_v63, %v2950_v39  ;;  %v879_v6 = vcombine.high %v863_v0, %v863_v0  ;;  %v880_v7 = vcombine.high %v870_v1, %v870_v1  ;;  %1116 = vmax.xlane.f32.xlu1 %v1115_v3  ;;  %892 = vst.msk [vmem:[%s3118_s14 + $0x1] sm:$0x1] %vm890_vm2, %v870_v1  ;;  %893 = vst.msk [vmem:[%s3118_s14 + $0x2] sm:$0x1] %vm890_vm2, %v878_v2 }
 0x307   : > { %895 = vst.msk [vmem:[%s3118_s14 + $0x4] sm:$0x1] %vm890_vm2, %v863_v0  ;;  %v1587_v8 = vpop.f32.mrf.mxu1  ;;  %v1159_v63 = vrot.slane %v1137_v57, %v2950_v39  ;;  %v1166_v0 = vrot.slane %v1138_v58, %v2950_v39  ;;  %v1659_v1 = vcombine.low %v1651_v59, %v1658_v60 }
 0x308   : > { %v881_v10 = vcombine.high %v877_v5, %v877_v5  ;;  %v1591_v11 = vsel %vm614_vm1, %v1587_v8, -inf  ;;  %894 = vst.msk [vmem:[%s3118_s14 + $0x3] sm:$0x1] %vm890_vm2, %v880_v7  ;;  %896 = vst.msk [vmem:[%s3118_s14 + $0x5] sm:$0x1] %vm890_vm2, %v877_v5 }
 0x309   : > { %897 = vst.msk [vmem:[%s3118_s14 + $0x6] sm:$0x1] %vm890_vm2, %v879_v6  ;;  %1592 = vmax.xlane.f32.xlu0 %v1591_v11  ;;  %v2632_v12 = vpop.f32.mrf.mxu1  ;;  %v1168_v3 = vcombine.low %v1159_v63, %v1166_v0  ;;  %v1867_v11 = vld [vmem:[%s3074_s13] sm:$0x1] }
 0x30a   : > { %898 = vst.msk [vmem:[%s3118_s14 + $0x7] sm:$0x1] %vm890_vm2, %v881_v10  ;;  %v1868_v12 = vld [vmem:[%s3074_s13 + $0x1] sm:$0x1] }
 0x30b   : > { %v3139_v13 = vpop.f32.mrf.mxu1  ;;  %v1182_v5 = vrot.slane %v1168_v3, %v2950_v39 }
 0x30c   : > { %v2067_v9 = vsel %vm614_vm1, %v3139_v13, -inf }
 0x30d   : > { %2068 = vmax.xlane.f32.xlu1 %v2067_v9  ;;  %v2642_v14 = vpop.f32.mrf.mxu1  ;;  %v1869_v9 = vld [vmem:[%s3074_s13 + $0x2] sm:$0x1] }
 0x30e   : > { %v1870_v14 = vld [vmem:[%s3074_s13 + $0x3] sm:$0x1] }
 0x30f   : > { %v2088_v21 = vcombine.low %v1869_v9, %v1870_v14 }
 0x311   : > { %v2104_v26 = vrot.slane %v2088_v21, %v2950_v39 }
 0x38f   : > { %v1117_v15 = vpop.xlane.xlu1 %1116 }
 0x390   : > { %v1118_v16 = vsub.f32 %v1111_v62, %v1117_v15  ;;  %v1152_v62 = vrot.slane %v1136_v56, %v2950_v39  ;;  %v1871_v15 = vld [vmem:[%s3074_s13 + $0x4] sm:$0x1]  ;;  %v3216_v56 = vsub.s32 0, %v2932_v28 }
 0x392   : > { %v1119_v17 = vmul.f32 1.442695, %v1118_v16  ;;  %v1593_v18 = vpop.xlane.xlu0 %1592  ;;  %v1167_v2 = vcombine.low %v1145_v61, %v1152_v62  ;;  %v1872_v16 = vld [vmem:[%s3074_s13 + $0x5] sm:$0x1] }
 0x393   : > { %v1594_v19 = vsub.f32 %v1587_v8, %v1593_v18  ;;  %v1874_v18 = vld [vmem:[%s3074_s13 + $0x7] sm:$0x1]  ;;  %v2089_v22 = vcombine.low %v1871_v15, %v1872_v16 }
 0x394   : > { %2716 = vpow2.f32 %v1119_v17  ;;  %v1175_v4 = vrot.slane %v1167_v2, %v2950_v39  ;;  %v1873_v17 = vld [vmem:[%s3074_s13 + $0x6] sm:$0x1] }
 0x395   : > { %v1595_v20 = vmul.f32 1.442695, %v1594_v19  ;;  %v2090_v23 = vcombine.low %v1873_v17, %v1874_v18  ;;  %v2111_v27 = vrot.slane %v2089_v22, %v2950_v39 }
 0x396   : > { %v1183_v6 = vcombine.low %v1175_v4, %v1182_v5  ;;  %v2069_v7 = vpop.xlane.xlu1 %2068 }
 0x397   : > { %2718 = vpow2.f32 %v1595_v20  ;;  %v2070_v8 = vsub.f32 %v3139_v13, %v2069_v7  ;;  %v2087_v20 = vcombine.low %v1867_v11, %v1868_v12  ;;  %v2118_v29 = vrot.slane %v2090_v23, %v2950_v39 }
 0x399   : > { %v2071_v10 = vmul.f32 1.442695, %v2070_v8  ;;  %v2097_v13 = vrot.slane %v2087_v20, %v2950_v39  ;;  %v2120_v31 = vcombine.low %v2111_v27, %v2118_v29 }
 0x39b   : > { %2720 = vpow2.f32 %v2071_v10  ;;  %v2119_v30 = vcombine.low %v2097_v13, %v2104_v26  ;;  %v2134_v33 = vrot.slane %v2120_v31, %v2950_v39 }
 0x39d   : > { %v2127_v32 = vrot.slane %v2119_v30, %v2950_v39 }
 0x39f   : > { %v2135_v34 = vcombine.low %v2127_v32, %v2134_v33 }
 0x3a1   : > { %v3151_v35 = vpop.eup %2716 }
 0x3a2   : > { %v1121_v36 = vsel %vm614_vm1, %v3151_v35, 0.0 }
 0x3a3   : > { %1122 = vadd.xlane.f32.xlu1 %v1121_v36 }
 0x3a4   : > { %v3162_v45 = vpop.eup %2718 }
 0x3a5   : > { %v1597_v49 = vsel %vm614_vm1, %v3162_v45, 0.0 }
 0x3a6   : > { %1598 = vadd.xlane.f32.xlu0 %v1597_v49 }
 0x3a8   : > { %v2721_v19 = vpop.eup %2720 }
 0x3a9   : > { %v2073_v24 = vsel %vm614_vm1, %v2721_v19, 0.0 }
 0x3b4   : > { %1660 = vrot.lane.b32.xlu1 %v1659_v1, %s2810_s11 }
 0x3bc   : > { %1184 = vrot.lane.b32.xlu0 %v1183_v6, %s2809_s10 }
 0x3d8   : > { %2074 = vadd.xlane.f32.xlu1 %v2073_v24 }
 0x3e9   : > { %2136 = vrot.lane.b32.xlu1 %v2135_v34, %s2811_s12 }
 0x42c   : > { %v1123_v36 = vpop.xlane.xlu1 %1122 }
 0x42d   : > { %2722 = vrcp.f32 %v1123_v36 }
 0x42f   : > { %v1599_v37 = vpop.xlane.xlu0 %1598 }
 0x430   : > { %2724 = vrcp.f32 %v1599_v37  ;;  %v1661_v43 = vpop.permute.xlu1 %1660 }
 0x433   : > { %v1185_v38 = vpop.permute.xlu0 %1184 }
 0x434   : > { %2624 = vmatpush3.msra.mxu0 %v1185_v38 }
 0x435   : > { %2633 = vmatprep.subr.mxu0 %v2806_v25 }
 0x43a   : > { %v2723_v40 = vpop.eup %2722 }
 0x43b   : > { %v1125_v41 = vmul.f32 %v2723_v40, %v3151_v35 }
 0x43d   : > { %v2725_v42 = vpop.eup %2724  ;;  %2626 = vmatmul.mubr.msk.f32.vlgmr.msra.gmra.mxu0 %vm614_vm1, %v1125_v41  ;;  %v1126_v47 = vadd.f32 %v1125_v41, %v3094_v51 }
 0x43e   : > { %2634 = vmatpush3.msra.mxu0 %v1661_v43  ;;  %2635 = vmatprep.mubr.msk.f32.mxu0 %vm2808_vm0, %v2806_v25  ;;  %v1601_v44 = vmul.f32 %v2725_v42, %v3162_v45 }
 0x43f   : > { %2643 = vmatprep.subr.mxu0 %v2806_v25 }
 0x440   : > { %v1602_v49 = vadd.f32 %v1601_v44, %v1126_v47 }
 0x441   : > { %2636 = vmatmul.mubr.msk.f32.vlgmr.msra.gmra.mxu0 %vm614_vm1, %v1601_v44 }
 0x442   : > { %2645 = vmatprep.mubr.msk.f32.mxu0 %vm2808_vm0, %v2806_v25 }
 0x461   : > { %v2075_v35 = vpop.xlane.xlu1 %2074 }
 0x462   : > { %2726 = vrcp.f32 %v2075_v35 }
 0x465   : > { %v2137_v46 = vpop.permute.xlu1 %2136 }
 0x466   : > { %2644 = vmatpush3.msra.mxu0 %v2137_v46 }
 0x46f   : > { %v2727_v48 = vpop.eup %2726 }
 0x470   : > { %v2077_v50 = vmul.f32 %v2727_v48, %v2721_v19 }
 0x472   : > { %v2078_v52 = vadd.f32 %v2077_v50, %v1602_v49  ;;  %2646 = vmatmul.mubr.msk.f32.vlgmr.msra.gmra.mxu0 %vm614_vm1, %v2077_v50 }
 0x474   : > { %v2327_v45 = vmul.f32 0.25, %v2078_v52 }
 0x476   : > { %2328 = vst.msk [vmem:[%s473_s21] sm:$0xff] %vm614_vm1, %v2327_v45 }
 0x4fd   : > { %v1256_v53 = vpop.f32.mrf.mxu0 }
 0x4fe   : > { %v1261_v54 = vcombine.high %v1256_v53, %v1256_v53  ;;  %v1268_v25 = vrot.slane %v1256_v53, %v2950_v39 }
 0x4ff   : > { %v2627_v55 = vpop.f32.mrf.mxu0 }
 0x500   : > { %v1275_v51 = vrot.slane %v1261_v54, %v2950_v39  ;;  %v1276_v57 = vcombine.high %v1268_v25, %v1268_v25  ;;  %v1284_v58 = vrot.slane %v1268_v25, %v2950_v39 }
 0x501   : > { %v1732_v59 = vpop.f32.mrf.mxu0 }
 0x502   : > { %v1298_v60 = vrot.slane %v1276_v57, %v2950_v39  ;;  %v1306_v61 = vcombine.high %v1284_v58, %v1284_v58  ;;  %v1313_v63 = vrot.slane %v1284_v58, %v3216_v56  ;;  %v1277_v0 = vcombine.high %v1275_v51, %v1275_v51 }
 0x503   : > { %v2637_v62 = vpop.f32.mrf.mxu0  ;;  %v1291_v28 = vrot.slane %v1275_v51, %v2950_v39  ;;  %v1744_v4 = vrot.slane %v1732_v59, %v2950_v39  ;;  %v1737_v10 = vcombine.high %v1732_v59, %v1732_v59 }
 0x504   : > { %v1317_v1 = vrot.slane %v1298_v60, %v3216_v56  ;;  %v1308_v2 = vcombine.high %v1298_v60, %v1298_v60  ;;  %1342 = vrot.lane.b32.xlu0 %v1313_v63, %s2812_s22  ;;  %v1321_v3 = vrot.slane %v1306_v61, %v3216_v56  ;;  %v1305_v6 = vrot.slane %v1277_v0, %v2950_v39 }
 0x505   : > { %v1329_v7 = vrot.slane %v1291_v28, %v3216_v56  ;;  %v1307_v8 = vcombine.high %v1291_v28, %v1291_v28  ;;  %v1752_v11 = vcombine.high %v1744_v4, %v1744_v4  ;;  %v1760_v14 = vrot.slane %v1744_v4, %v2950_v39 }
 0x506   : > { %1344 = vrot.lane.b32.xlu1 %v1317_v1, %s2812_s22  ;;  %v1325_v5 = vrot.slane %v1308_v2, %v3216_v56  ;;  %v1333_v12 = vrot.slane %v1305_v6, %v3216_v56  ;;  %v1309_v9 = vcombine.high %v1305_v6, %v1305_v6  ;;  %v1751_v16 = vrot.slane %v1737_v10, %v2950_v39 }
 0x507   : > { %v1337_v15 = vrot.slane %v1307_v8, %v3216_v56  ;;  %v1774_v17 = vrot.slane %v1752_v11, %v2950_v39  ;;  %v1782_v19 = vcombine.high %v1760_v14, %v1760_v14  ;;  %v1789_v20 = vrot.slane %v1760_v14, %v3216_v56 }
 0x508   : > { %1346 = vrot.lane.b32.xlu0 %v1321_v3, %s2812_s22  ;;  %v1341_v18 = vrot.slane %v1309_v9, %v3216_v56  ;;  %v1753_v21 = vcombine.high %v1751_v16, %v1751_v16  ;;  %v1767_v24 = vrot.slane %v1751_v16, %v2950_v39 }
 0x509   : > { %v1793_v22 = vrot.slane %v1774_v17, %v3216_v56  ;;  %v1784_v23 = vcombine.high %v1774_v17, %v1774_v17  ;;  %v1797_v13 = vrot.slane %v1782_v19, %v3216_v56 }
 0x50a   : > { %1348 = vrot.lane.b32.xlu1 %v1325_v5, %s2812_s22  ;;  %v1781_v27 = vrot.slane %v1753_v21, %v2950_v39  ;;  %v1805_v29 = vrot.slane %v1767_v24, %v3216_v56  ;;  %v1783_v30 = vcombine.high %v1767_v24, %v1767_v24 }
 0x50b   : > { %v1801_v26 = vrot.slane %v1784_v23, %v3216_v56 }
 0x50c   : > { %1350 = vrot.lane.b32.xlu0 %v1329_v7, %s2812_s22  ;;  %v1809_v31 = vrot.slane %v1781_v27, %v3216_v56  ;;  %v1785_v32 = vcombine.high %v1781_v27, %v1781_v27  ;;  %v1813_v33 = vrot.slane %v1783_v30, %v3216_v56 }
 0x50e   : > { %1352 = vrot.lane.b32.xlu1 %v1333_v12, %s2812_s22  ;;  %v1817_v34 = vrot.slane %v1785_v32, %v3216_v56 }
 0x510   : > { %1354 = vrot.lane.b32.xlu0 %v1337_v15, %s2812_s22 }
 0x512   : > { %1356 = vrot.lane.b32.xlu1 %v1341_v18, %s2812_s22 }
 0x514   : > { %1818 = vrot.lane.b32.xlu0 %v1789_v20, %s2813_s24 }
 0x516   : > { %1820 = vrot.lane.b32.xlu1 %v1793_v22, %s2813_s24 }
 0x518   : > { %1822 = vrot.lane.b32.xlu0 %v1797_v13, %s2813_s24 }
 0x51a   : > { %1824 = vrot.lane.b32.xlu1 %v1801_v26, %s2813_s24 }
 0x51c   : > { %1826 = vrot.lane.b32.xlu0 %v1805_v29, %s2813_s24 }
 0x51e   : > { %1828 = vrot.lane.b32.xlu1 %v1809_v31, %s2813_s24 }
 0x520   : > { %1830 = vrot.lane.b32.xlu0 %v1813_v33, %s2813_s24 }
 0x522   : > { %1832 = vrot.lane.b32.xlu1 %v1817_v34, %s2813_s24 }
 0x532   : > { %v2208_v36 = vpop.f32.mrf.mxu0 }
 0x533   : > { %v2213_v37 = vcombine.high %v2208_v36, %v2208_v36  ;;  %v2220_v38 = vrot.slane %v2208_v36, %v2950_v39 }
 0x534   : > { %v2647_v40 = vpop.f32.mrf.mxu0 }
 0x535   : > { %v2227_v41 = vrot.slane %v2213_v37, %v2950_v39  ;;  %v2228_v42 = vcombine.high %v2220_v38, %v2220_v38  ;;  %v2236_v43 = vrot.slane %v2220_v38, %v2950_v39 }
 0x537   : > { %v2250_v44 = vrot.slane %v2228_v42, %v2950_v39  ;;  %v2258_v35 = vcombine.high %v2236_v43, %v2236_v43  ;;  %v2265_v46 = vrot.slane %v2236_v43, %v3216_v56  ;;  %v2229_v47 = vcombine.high %v2227_v41, %v2227_v41 }
 0x538   : > { %v2243_v50 = vrot.slane %v2227_v41, %v2950_v39 }
 0x539   : > { %v2269_v48 = vrot.slane %v2250_v44, %v3216_v56  ;;  %v2260_v49 = vcombine.high %v2250_v44, %v2250_v44  ;;  %2294 = vrot.lane.b32.xlu0 %v2265_v46, %s2814_s27  ;;  %v2273_v52 = vrot.slane %v2258_v35, %v3216_v56  ;;  %v2257_v53 = vrot.slane %v2229_v47, %v2950_v39 }
 0x53a   : > { %v2281_v54 = vrot.slane %v2243_v50, %v3216_v56  ;;  %v2259_v25 = vcombine.high %v2243_v50, %v2243_v50 }
 0x53b   : > { %2296 = vrot.lane.b32.xlu1 %v2269_v48, %s2814_s27  ;;  %v2277_v45 = vrot.slane %v2260_v49, %v3216_v56  ;;  %v2285_v55 = vrot.slane %v2257_v53, %v3216_v56  ;;  %v2261_v51 = vcombine.high %v2257_v53, %v2257_v53 }
 0x53c   : > { %v2289_v57 = vrot.slane %v2259_v25, %v3216_v56 }
 0x53d   : > { %2298 = vrot.lane.b32.xlu0 %v2273_v52, %s2814_s27  ;;  %v2293_v58 = vrot.slane %v2261_v51, %v3216_v56 }
 0x53f   : > { %2300 = vrot.lane.b32.xlu1 %v2277_v45, %s2814_s27 }
 0x541   : > { %2302 = vrot.lane.b32.xlu0 %v2281_v54, %s2814_s27 }
 0x543   : > { %2304 = vrot.lane.b32.xlu1 %v2285_v55, %s2814_s27 }
 0x545   : > { %2306 = vrot.lane.b32.xlu0 %v2289_v57, %s2814_s27 }
 0x547   : > { %2308 = vrot.lane.b32.xlu1 %v2293_v58, %s2814_s27 }
 0x576   : > { %v1343_v39 = vpop.permute.xlu0 %1342 }
 0x577   : > { %1367 = vst.msk [vmem:[%s3118_s14] sm:$0x1] %vm1366_vm3, %v1343_v39 }
 0x578   : > { %v1345_v59 = vpop.permute.xlu1 %1344 }
 0x579   : > { %1368 = vst.msk [vmem:[%s3118_s14 + $0x1] sm:$0x1] %vm1366_vm3, %v1345_v59 }
 0x57a   : > { %v1347_v60 = vpop.permute.xlu0 %1346 }
 0x57b   : > { %1369 = vst.msk [vmem:[%s3118_s14 + $0x2] sm:$0x1] %vm1366_vm3, %v1347_v60 }
 0x57c   : > { %v1349_v61 = vpop.permute.xlu1 %1348 }
 0x57d   : > { %1370 = vst.msk [vmem:[%s3118_s14 + $0x3] sm:$0x1] %vm1366_vm3, %v1349_v61 }
 0x57e   : > { %v1351_v56 = vpop.permute.xlu0 %1350 }
 0x57f   : > { %1371 = vst.msk [vmem:[%s3118_s14 + $0x4] sm:$0x1] %vm1366_vm3, %v1351_v56 }
 0x580   : > { %v1353_v62 = vpop.permute.xlu1 %1352 }
 0x581   : > { %1372 = vst.msk [vmem:[%s3118_s14 + $0x5] sm:$0x1] %vm1366_vm3, %v1353_v62 }
 0x582   : > { %v1355_v63 = vpop.permute.xlu0 %1354 }
 0x583   : > { %1373 = vst.msk [vmem:[%s3118_s14 + $0x6] sm:$0x1] %vm1366_vm3, %v1355_v63 }
 0x584   : > { %v1357_v0 = vpop.permute.xlu1 %1356 }
 0x585   : > { %1374 = vst.msk [vmem:[%s3118_s14 + $0x7] sm:$0x1] %vm1366_vm3, %v1357_v0 }
 0x586   : > { %v1819_v1 = vpop.permute.xlu0 %1818 }
 0x587   : > { %1843 = vst.msk [vmem:[%s3118_s14] sm:$0x1] %vm1842_vm4, %v1819_v1 }
 0x588   : > { %v1821_v2 = vpop.permute.xlu1 %1820 }
 0x589   : > { %1844 = vst.msk [vmem:[%s3118_s14 + $0x1] sm:$0x1] %vm1842_vm4, %v1821_v2 }
 0x58a   : > { %v1823_v28 = vpop.permute.xlu0 %1822 }
 0x58b   : > { %1845 = vst.msk [vmem:[%s3118_s14 + $0x2] sm:$0x1] %vm1842_vm4, %v1823_v28 }
 0x58c   : > { %v1825_v3 = vpop.permute.xlu1 %1824 }
 0x58d   : > { %1846 = vst.msk [vmem:[%s3118_s14 + $0x3] sm:$0x1] %vm1842_vm4, %v1825_v3 }
 0x58e   : > { %v1827_v4 = vpop.permute.xlu0 %1826 }
 0x58f   : > { %1847 = vst.msk [vmem:[%s3118_s14 + $0x4] sm:$0x1] %vm1842_vm4, %v1827_v4 }
 0x590   : > { %v1829_v5 = vpop.permute.xlu1 %1828 }
 0x591   : > { %1848 = vst.msk [vmem:[%s3118_s14 + $0x5] sm:$0x1] %vm1842_vm4, %v1829_v5 }
 0x592   : > { %v1831_v6 = vpop.permute.xlu0 %1830 }
 0x593   : > { %1849 = vst.msk [vmem:[%s3118_s14 + $0x6] sm:$0x1] %vm1842_vm4, %v1831_v6 }
 0x594   : > { %v1833_v7 = vpop.permute.xlu1 %1832 }
 0x595   : > { %1850 = vst.msk [vmem:[%s3118_s14 + $0x7] sm:$0x1] %vm1842_vm4, %v1833_v7 }
 0x5ab   : > { %v2295_v8 = vpop.permute.xlu0 %2294 }
 0x5ac   : > { %2319 = vst.msk [vmem:[%s3118_s14] sm:$0x1] %vm2318_vm5, %v2295_v8 }
 0x5ad   : > { %v2297_v10 = vpop.permute.xlu1 %2296 }
 0x5ae   : > { %2320 = vst.msk [vmem:[%s3118_s14 + $0x1] sm:$0x1] %vm2318_vm5, %v2297_v10 }
 0x5af   : > { %v2299_v11 = vpop.permute.xlu0 %2298 }
 0x5b0   : > { %2321 = vst.msk [vmem:[%s3118_s14 + $0x2] sm:$0x1] %vm2318_vm5, %v2299_v11 }
 0x5b1   : > { %v2301_v12 = vpop.permute.xlu1 %2300 }
 0x5b2   : > { %2322 = vst.msk [vmem:[%s3118_s14 + $0x3] sm:$0x1] %vm2318_vm5, %v2301_v12 }
 0x5b3   : > { %v2303_v9 = vpop.permute.xlu0 %2302  ;;  %v2361_v17 = vld [vmem:[%s3118_s14] sm:$0x1] (%p2884_p5) }
 0x5b4   : > { %2323 = vst.msk [vmem:[%s3118_s14 + $0x4] sm:$0x1] %vm2318_vm5, %v2303_v9  ;;  %2362 = vst [vmem:[%s2344_s8] sm:$0x1] (%p2884_p5), %v2361_v17 }
 0x5b5   : > { %v2305_v14 = vpop.permute.xlu1 %2304  ;;  %v2363_v18 = vld [vmem:[%s3118_s14 + $0x1] sm:$0x1] (%p2884_p5) }
 0x5b6   : > { %2324 = vst.msk [vmem:[%s3118_s14 + $0x5] sm:$0x1] %vm2318_vm5, %v2305_v14  ;;  %2340 = sbr.rel (!%p2884_p5) target bundleno = 1475 (0x5c3), region = 159  ;;  %2364 = vst [vmem:[%s2344_s8 + $0x2] sm:$0x1] (%p2884_p5), %v2363_v18 }
 0x5b7   : > { %v2307_v15 = vpop.permute.xlu0 %2306  ;;  %v2365_v19 = vld [vmem:[%s3118_s14 + $0x2] sm:$0x1] (%p2884_p5) }
 0x5b8   : > { %2325 = vst.msk [vmem:[%s3118_s14 + $0x6] sm:$0x1] %vm2318_vm5, %v2307_v15  ;;  %2366 = vst [vmem:[%s2344_s8 + $0x4] sm:$0x1] (%p2884_p5), %v2365_v19 }
 0x5b9   : > { %v2309_v16 = vpop.permute.xlu1 %2308  ;;  %v2367_v20 = vld [vmem:[%s3118_s14 + $0x3] sm:$0x1] (%p2884_p5) }
 0x5ba   : > { %2326 = vst.msk [vmem:[%s3118_s14 + $0x7] sm:$0x1] %vm2318_vm5, %v2309_v16  ;;  %2368 = vst [vmem:[%s2344_s8 + $0x6] sm:$0x1] (%p2884_p5), %v2367_v20 }
 0x5bb   : > { %v2369_v21 = vld [vmem:[%s3118_s14 + $0x4] sm:$0x1] }
 0x5bc   : > { %2370 = vst [vmem:[%s2344_s8 + $0x8] sm:$0x1] %v2369_v21 }
 0x5bd   : > { %v2371_v22 = vld [vmem:[%s3118_s14 + $0x5] sm:$0x1] }
 0x5be   : > { %2372 = vst [vmem:[%s2344_s8 + $0xa] sm:$0x1] %v2371_v22 }
 0x5bf   : > { %v2373_v23 = vld [vmem:[%s3118_s14 + $0x6] sm:$0x1] }
 0x5c0   : > { %2374 = vst [vmem:[%s2344_s8 + $0xc] sm:$0x1] %v2373_v23 }
 0x5c1   : > { %v2375_v24 = vld [vmem:[%s3118_s14 + $0x7] sm:$0x1] }
 0x5c2   : > { %2376 = vst [vmem:[%s2344_s8 + $0xe] sm:$0x1] %v2375_v24 }
 0x5c3 PF: > { %s2589_s25 = sshll.u32 %s2796_s18, 7  ;;  %s2424_s9 = sshll.u32 %s473_s21, 4  ;;  %s2425_s9 = int_to_ptr.vmem [resolvable:$true] %s2424_s9 }
 0x5c4   : > { %s2422_s12 = scalar_lea.hbm %s3371_s4, %s2589_s25  ;;  %s2728_s13 = scalar_lea.vmem %s2425_s9, 128 }
 0x5c5   : > { %p2729_p0 = scmp.ne.s32.totalorder %s2425_s9, %s2728_s13  ;;  %s2815_s14 = smov [#allocation6]  }
 0x5c6   : > { %s2732_s22 = sshll.u32 %s2815_s14, 4  ;;  %s2733_s22 = int_to_ptr.vmem [resolvable:$false] %s2732_s22 }
 0x5c7   : > { %p2730_p1 = pnand %p2729_p0, %p2884_p5  ;;  %s2734_s24 = scalar_lea.vmem %s2733_s22, 256 }
 0x5c8   : > { %p2735_p3 = scmp.lt.s32.totalorder %s2425_s9, %s2733_s22  ;;  %p2736_p4 = scmp.lt.s32.totalorder %s2734_s24, %s2728_s13 }
 0x5c9   : > { %p2731_p2 = pneg %p2730_p1 }
 0x5ca   : > { %p2737_p6 = por %p2736_p4, %p2735_p3 }
 0x5cc   : > { %p2738_p7 = pnand %p2737_p6, %p2731_p2 }
 0x5ce   : > { %2741 = shalt.err (!%p2738_p7)
}
 0x5cf   : > { %s2742_s18 = scalar_lea.hbm %s2422_s12, 128  ;;  %s2746_s27 = scalar_lea.hbm %s3371_s4, 256 }
 0x5d0   : > { %p2743_p8 = scmp.ne.s32.totalorder %s2422_s12, %s2742_s18  ;;  %p2747_p13 = scmp.lt.s32.totalorder %s2422_s12, %s3371_s4 }
 0x5d1   : > { %p2748_p0 = scmp.lt.s32.totalorder %s2746_s27, %s2742_s18 }
 0x5d2   : > { %p2744_p11 = pnand %p2743_p8, %p2884_p5 }
 0x5d3   : > { %p2749_p1 = por %p2748_p0, %p2747_p13 }
 0x5d4   : > { %p2745_p12 = pneg %p2744_p11 }
 0x5d6   : > { %p2750_p10 = pnand %p2749_p1, %p2745_p12 }
 0x5d8   : > { %2753 = shalt.err (!%p2750_p10)
}
 0x5d9   : > { %2648 = dma.vmem_to_hbm [thread:$0]  (%p2884_p5), %s2425_s9, 128, %s2422_s12, %s3309_s30  }
 0x5da PF: > { %s2443_s8 = sand.u32 1, %s2784_s15   ;;  %p3376_p2 = scmp.ge.s32.totalorder %s2804_s20, 2 }
 0x5db   : > { %s2444_s25 = scalar_lea.sflag [#allocation7], %s2443_s8 }
 0x5dc   : > { %p2651_p3 = pnand %p3376_p2, %p2895_p9 }
 0x5de   : > { %p2652_p4 = pneg %p2651_p3 }
 0x5e0   : > { %2779 = dma.done.wait (%p2652_p4), %s2444_s25, 128  }
 0x5e1   : > { %2781 = vsyncadd (%p2652_p4), %s2444_s25, 4294967168  ;;  %s18_s20 = sadd.s32 1, %s2804_s20   ;;  %s3377_s15 = smov %s2788_s16 }
 0x5e2   : > { %p15_p6 = scmp.ge.s32.totalorder %s18_s20, 4   ;;  %s3378_s16 = smov %s2792_s17 }
 0x5e3   : > { %s3379_s17 = smov %s2893_s28  ;;  %s3380_s18 = smov %s2800_s19 }
 0x5e4   : > { %s3381_s19 = smov %s3383_s23  ;;  %17 = sbr.rel (!%p15_p6) target bundleno = 4 (0x4), region = 264 }
 0x5e9   :  { %2449 = vsyncpa [#allocation7], 1 }
 0x5ea   :  { %2451 = vsyncpa [#allocation7 + $0x1], 1 }

</bundles_post_ra>
